<compile_context>
chip_gen: v7x
topology: tpu7x:2x2x1
jax: 0.10.0
libtpu: 0.0.40
codegen_flags: <defaults>
</compile_context>

<pallas_src>
import numpy as np
import jax
import jax.numpy as jnp
from jax import lax
from jax.experimental import pallas as pl
from jax.experimental.pallas import tpu as pltpu

IMAGE_SIZE = 224
LANES = 128
MEAN = np.array([131.0912, 103.8827, 91.4953], dtype=np.float32)
STD = np.array([1.0, 1.0, 1.0], dtype=np.float32)

# Baked-in epilogue constants:  (x - mean) / std  ==  x * (1/std) - mean/std.
_MEAN_OVER_STD = [float(v) for v in (MEAN / STD)]
_INV_STD = [float(v) for v in (1.0 / STD)]
_STD_IS_ONE = bool(np.all(STD == 1.0))


def _adaptive_pool_matrix(in_size: int, out_size: int) -> np.ndarray:
    """Row-stochastic P (out, in) with P @ x == adaptive_avg_pool1d(x) (PyTorch bins)."""
    P = np.zeros((out_size, in_size), dtype=np.float32)
    for i in range(out_size):
        start = (i * in_size) // out_size
        end = -((-(i + 1) * in_size) // out_size)  # ceil division
        P[i, start:end] = 1.0 / (end - start)
    return P


def _epilogue(y, c):
    """(y - mean[c]) / std[c] with scalar constants folded at trace time."""
    if _STD_IS_ONE:
        return y - _MEAN_OVER_STD[c]
    return y * _INV_STD[c] - _MEAN_OVER_STD[c]


# ---------------------------------------------------------------------------
# No-resize branch: pure per-channel normalization on a lane-dense view.
# ---------------------------------------------------------------------------

def _make_norm_kernel(C):
    def kernel(x_ref, o_ref):
        # x_ref / o_ref: (nb, C, rb, 128)
        for c in range(C):
            x = x_ref[:, c].astype(jnp.float32)
            o_ref[:, c] = _epilogue(x, c)
    return kernel


def _batches_per_block(B, C, itemsize, target_bytes=4 << 20):
    per_image = C * IMAGE_SIZE * IMAGE_SIZE * max(int(itemsize), 4)  # output is f32
    best = 1
    for nb in range(1, B + 1):
        if B % nb:
            continue
        if nb * per_image > target_bytes:
            continue
        if B >= 2 and B // nb < 2:  # keep >= 2 grid steps for megacore (v7x)
            continue
        best = nb
    return best


def _norm_branch(image, B, C):
    rows = IMAGE_SIZE * IMAGE_SIZE // LANES            # 392 (multiple of 8)
    x = image.reshape(B, C, rows, LANES)               # free view of contiguous NCHW
    nb = _batches_per_block(B, C, np.dtype(image.dtype).itemsize)
    nblk = B // nb
    if nblk >= 2:
        nrb, rb = 1, rows
    else:                                              # B == 1: split rows across cores
        nrb, rb = 7, rows // 7                         # 56-row blocks (multiple of 8)

    out = pl.pallas_call(
        _make_norm_kernel(C),
        out_shape=jax.ShapeDtypeStruct((B, C, rows, LANES), jnp.float32),
        grid=(nblk, nrb),
        in_specs=[pl.BlockSpec((nb, C, rb, LANES), lambda i, r: (i, 0, r, 0))],
        out_specs=pl.BlockSpec((nb, C, rb, LANES), lambda i, r: (i, 0, r, 0)),
        compiler_params=pltpu.CompilerParams(
            dimension_semantics=("parallel", "parallel")),
    )(x)
    return out.reshape(B, C, IMAGE_SIZE, IMAGE_SIZE)


# ---------------------------------------------------------------------------
# Pool branch: adaptive_avg_pool2d(x, 224) as two MXU GEMMs + fused epilogue.
# ---------------------------------------------------------------------------

def _make_pool_kernel(C, w_first):
    def kernel(pht_ref, pwt_ref, x_ref, o_ref, acc_ref):
        h = pl.program_id(1)

        @pl.when(h == 0)
        def _init():
            acc_ref[...] = jnp.zeros_like(acc_ref)

        pht = pht_ref[...]                     # (th, 224)  == P_h[:, h-chunk]^T
        pwt = pwt_ref[...]                     # (W, 224)   == P_w^T
        # C == 3, so per-channel GEMMs are cheap to unroll; fusing channels
        # would need in-kernel relayouts for little gain in this DMA-bound regime.
        for c in range(C):
            xc = x_ref[c].astype(jnp.float32)  # (th, W)
            if w_first:
                # Contract W first (cheaper when H <= W; required when tiling H).
                t = jnp.dot(xc, pwt, preferred_element_type=jnp.float32)   # (th, 224)
                acc_ref[c] += lax.dot_general(
                    pht, t, (((0,), (0,)), ((), ())),
                    preferred_element_type=jnp.float32)                    # (224, 224)
            else:
                # Contract H first (cheaper when W < H; only used when th == H).
                t = lax.dot_general(
                    pht, xc, (((0,), (0,)), ((), ())),
                    preferred_element_type=jnp.float32)                    # (224, W)
                acc_ref[c] += jnp.dot(t, pwt, preferred_element_type=jnp.float32)

        @pl.when(h == pl.num_programs(1) - 1)
        def _finalize():
            for c in range(C):
                o_ref[c] = _epilogue(acc_ref[c], c)
    return kernel


def _choose_h_tile(H, W, C, itemsize, budget_bytes=8 << 20):
    """Largest H-tile (divisor of H, multiple of 8) whose input block fits the budget."""
    if C * H * W * itemsize <= budget_bytes:
        return H
    best = None
    for th in range(8, H + 1, 8):
        if H % th == 0 and C * th * W * itemsize <= budget_bytes:
            best = th
    return best if best is not None else H


def _pool_branch(image, B, C, H, W):
    th = _choose_h_tile(H, W, C, np.dtype(image.dtype).itemsize)
    nH = H // th
    # Second GEMM costs 224*224*H (w_first) vs 224*224*W (h_first); pick the
    # cheaper order when the whole H fits in one block.
    w_first = not (nH == 1 and W < H)

    # Pool matrices stored transposed so their blocks stay lane-dense (last dim 224).
    # Note: pwt is grid-invariant (and pht along batch); single-buffering them via
    # pipeline_mode would save a little more VMEM on v7x.
    pht = jnp.asarray(_adaptive_pool_matrix(H, IMAGE_SIZE).T)   # (H, 224)
    pwt = jnp.asarray(_adaptive_pool_matrix(W, IMAGE_SIZE).T)   # (W, 224)

    return pl.pallas_call(
        _make_pool_kernel(C, w_first),
        out_shape=jax.ShapeDtypeStruct((B, C, IMAGE_SIZE, IMAGE_SIZE), jnp.float32),
        grid=(B, nH),
        in_specs=[
            pl.BlockSpec((th, IMAGE_SIZE), lambda b, h: (h, 0)),
            pl.BlockSpec((W, IMAGE_SIZE), lambda b, h: (0, 0)),
            pl.BlockSpec((None, C, th, W), lambda b, h: (b, 0, h, 0)),
        ],
        out_specs=pl.BlockSpec((None, C, IMAGE_SIZE, IMAGE_SIZE),
                               lambda b, h: (b, 0, 0, 0)),
        scratch_shapes=[pltpu.VMEM((C, IMAGE_SIZE, IMAGE_SIZE), jnp.float32)],
        compiler_params=pltpu.CompilerParams(
            dimension_semantics=("parallel", "arbitrary"),
            vmem_limit_bytes=48 * 1024 * 1024),
    )(pht, pwt, image)


def vgg_face_processing(image):
    """Pallas equivalent of VGGFaceProcessing.forward. image: (B, 3, H, W)."""
    B, C, H, W = image.shape
    if C != MEAN.shape[0]:
        raise ValueError(f"expected {MEAN.shape[0]} channels, got {C}")
    if H == IMAGE_SIZE and W == IMAGE_SIZE:
        return _norm_branch(image, B, C)
    return _pool_branch(image, B, C, H, W)


def _reference(image):
    """Pure-JAX reference mirroring the PyTorch forward."""
    x = image.astype(jnp.float32)
    B, C, H, W = image.shape
    if H != IMAGE_SIZE or W != IMAGE_SIZE:
        ph = jnp.asarray(_adaptive_pool_matrix(H, IMAGE_SIZE))
        pw = jnp.asarray(_adaptive_pool_matrix(W, IMAGE_SIZE))
        x = jnp.einsum('oh,bchw,pw->bcop', ph, x, pw)
    m = jnp.asarray(MEAN)[None, :, None, None]
    s = jnp.asarray(STD)[None, :, None, None]
    return (x - m) / s


if __name__ == "__main__":
    key = jax.random.PRNGKey(0)
    k1, k2 = jax.random.split(key)

    # Small image -> exercises the adaptive_avg_pool2d (16x16 -> 224x224) branch.
    img_small = jax.random.uniform(k1, (2, 3, 16, 16), dtype=jnp.float32,
                                   minval=0.0, maxval=255.0)
    out_pool = jax.block_until_ready(vgg_face_processing(img_small))
    ref_pool = jax.block_until_ready(_reference(img_small))
    assert out_pool.shape == (2, 3, IMAGE_SIZE, IMAGE_SIZE)
    assert out_pool.dtype == jnp.float32
    assert np.allclose(np.asarray(out_pool), np.asarray(ref_pool),
                       atol=1e-3, rtol=1e-4)

    # 224x224 image -> exercises the no-resize (pure normalization) branch.
    img_full = jax.random.uniform(k2, (2, 3, IMAGE_SIZE, IMAGE_SIZE),
                                  dtype=jnp.float32, minval=0.0, maxval=255.0)
    out_norm = jax.block_until_ready(vgg_face_processing(img_full))
    ref_norm = jax.block_until_ready(_reference(img_full))
    assert out_norm.shape == (2, 3, IMAGE_SIZE, IMAGE_SIZE)
    assert out_norm.dtype == jnp.float32
    assert np.allclose(np.asarray(out_norm), np.asarray(ref_norm),
                       atol=1e-3, rtol=1e-4)

    print("KERNEL_OK")
</pallas_src>

<mosaic_0001>
module attributes {stable_mosaic.version = 11 : i64} {
  func.func @kernel(%arg0: i32, %arg1: i32, %arg2: memref<16x224xf32, #tpu.memory_space<vmem>>, %arg3: memref<16x224xf32, #tpu.memory_space<vmem>>, %arg4: memref<1x3x16x16xf32, #tpu.memory_space<vmem>>, %arg5: memref<1x3x224x224xf32, #tpu.memory_space<vmem>>, %arg6: memref<3x224x224xf32, #tpu.memory_space<vmem>>) attributes {dimension_semantics = [#tpu.dimension_semantics<parallel>, #tpu.dimension_semantics<arbitrary>], iteration_bounds = array<i64: 2, 1>, scalar_prefetch = 0 : i64, scratch_operands = 1 : i64, tpu.core_type = #tpu.core_type<tc>, window_params = [{transform_indices = @transform_0, window_bounds = array<i64: 16, 224>}, {pipeline_mode = #tpu.pipeline_mode<synchronous>, transform_indices = @transform_1, window_bounds = array<i64: 16, 224>}, {transform_indices = @transform_2, window_bounds = array<i64: 1, 3, 16, 16>}, {transform_indices = @transform_3, window_bounds = array<i64: 1, 3, 224, 224>}]} {
    %c0_i32 = arith.constant 0 : i32
    %0 = arith.cmpi eq, %arg1, %c0_i32 : i32
    %1 = arith.extui %0 : i1 to i32
    %c0_i32_0 = arith.constant 0 : i32
    %2 = arith.cmpi ne, %1, %c0_i32_0 : i32
    scf.if %2 {
      %cst_39 = arith.constant 0.000000e+00 : f32
      %38 = vector.broadcast %cst_39 : f32 to vector<3x224x224xf32>
      %c0_40 = arith.constant 0 : index
      %c0_41 = arith.constant 0 : index
      %c0_42 = arith.constant 0 : index
      %39 = vector.load %arg6[%c0_40, %c0_41, %c0_42] : memref<3x224x224xf32, #tpu.memory_space<vmem>>, vector<3x224x224xf32>
      tpu.vector_store %arg6[%c0_40, %c0_41, %c0_42], %38 {strides = array<i32>} : memref<3x224x224xf32, #tpu.memory_space<vmem>>, vector<3x224x224xf32>,
    } else {
    }
    %c0 = arith.constant 0 : index
    %c0_1 = arith.constant 0 : index
    %3 = vector.load %arg2[%c0, %c0_1] : memref<16x224xf32, #tpu.memory_space<vmem>>, vector<16x224xf32>
    %c0_2 = arith.constant 0 : index
    %c0_3 = arith.constant 0 : index
    %4 = vector.load %arg3[%c0_2, %c0_3] : memref<16x224xf32, #tpu.memory_space<vmem>>, vector<16x224xf32>
    %c0_4 = arith.constant 0 : index
    %c0_5 = arith.constant 0 : index
    %c0_6 = arith.constant 0 : index
    %c0_7 = arith.constant 0 : index
    %5 = vector.load %arg4[%c0_4, %c0_5, %c0_6, %c0_7] : memref<1x3x16x16xf32, #tpu.memory_space<vmem>>, vector<1x1x16x16xf32>
    %6 = vector.shape_cast %5 : vector<1x1x16x16xf32> to vector<16x16xf32>
    %cst = arith.constant dense<0.000000e+00> : vector<16x224xf32>
    %7 = tpu.matmul %6, %4, %cst {dimension_numbers = #tpu.dot_dimension_numbers<[1], [0], [0], [1], [0, 0, 1, 1], [], []>} : vector<16x16xf32>, vector<16x224xf32>, vector<16x224xf32> -> vector<16x224xf32>
    %c0_8 = arith.constant 0 : index
    %c0_9 = arith.constant 0 : index
    %c0_10 = arith.constant 0 : index
    %8 = vector.load %arg6[%c0_8, %c0_9, %c0_10] : memref<3x224x224xf32, #tpu.memory_space<vmem>>, vector<1x224x224xf32>
    %9 = vector.shape_cast %8 : vector<1x224x224xf32> to vector<224x224xf32>
    %cst_11 = arith.constant dense<0.000000e+00> : vector<224x224xf32>
    %10 = tpu.matmul %3, %7, %cst_11 {dimension_numbers = #tpu.dot_dimension_numbers<[0], [0], [1], [1], [0, 1, 1, 1], [], []>} : vector<16x224xf32>, vector<16x224xf32>, vector<224x224xf32> -> vector<224x224xf32>
    %11 = arith.addf %9, %10 : vector<224x224xf32>
    %c0_12 = arith.constant 0 : index
    %c0_13 = arith.constant 0 : index
    %c0_14 = arith.constant 0 : index
    %12 = vector.load %arg6[%c0_12, %c0_13, %c0_14] : memref<3x224x224xf32, #tpu.memory_space<vmem>>, vector<1x224x224xf32>
    %13 = vector.shape_cast %12 : vector<1x224x224xf32> to vector<224x224xf32>
    %14 = vector.shape_cast %11 : vector<224x224xf32> to vector<1x224x224xf32>
    tpu.vector_store %arg6[%c0_12, %c0_13, %c0_14], %14 {strides = array<i32>} : memref<3x224x224xf32, #tpu.memory_space<vmem>>, vector<1x224x224xf32>,
    %c0_15 = arith.constant 0 : index
    %c1 = arith.constant 1 : index
    %c0_16 = arith.constant 0 : index
    %c0_17 = arith.constant 0 : index
    %15 = vector.load %arg4[%c0_15, %c1, %c0_16, %c0_17] : memref<1x3x16x16xf32, #tpu.memory_space<vmem>>, vector<1x1x16x16xf32>
    %16 = vector.shape_cast %15 : vector<1x1x16x16xf32> to vector<16x16xf32>
    %cst_18 = arith.constant dense<0.000000e+00> : vector<16x224xf32>
    %17 = tpu.matmul %16, %4, %cst_18 {dimension_numbers = #tpu.dot_dimension_numbers<[1], [0], [0], [1], [0, 0, 1, 1], [], []>} : vector<16x16xf32>, vector<16x224xf32>, vector<16x224xf32> -> vector<16x224xf32>
    %c1_19 = arith.constant 1 : index
    %c0_20 = arith.constant 0 : index
    %c0_21 = arith.constant 0 : index
    %18 = vector.load %arg6[%c1_19, %c0_20, %c0_21] : memref<3x224x224xf32, #tpu.memory_space<vmem>>, vector<1x224x224xf32>
    %19 = vector.shape_cast %18 : vector<1x224x224xf32> to vector<224x224xf32>
    %cst_22 = arith.constant dense<0.000000e+00> : vector<224x224xf32>
    %20 = tpu.matmul %3, %17, %cst_22 {dimension_numbers = #tpu.dot_dimension_numbers<[0], [0], [1], [1], [0, 1, 1, 1], [], []>} : vector<16x224xf32>, vector<16x224xf32>, vector<224x224xf32> -> vector<224x224xf32>
    %21 = arith.addf %19, %20 : vector<224x224xf32>
    %c1_23 = arith.constant 1 : index
    %c0_24 = arith.constant 0 : index
    %c0_25 = arith.constant 0 : index
    %22 = vector.load %arg6[%c1_23, %c0_24, %c0_25] : memref<3x224x224xf32, #tpu.memory_space<vmem>>, vector<1x224x224xf32>
    %23 = vector.shape_cast %22 : vector<1x224x224xf32> to vector<224x224xf32>
    %24 = vector.shape_cast %21 : vector<224x224xf32> to vector<1x224x224xf32>
    tpu.vector_store %arg6[%c1_23, %c0_24, %c0_25], %24 {strides = array<i32>} : memref<3x224x224xf32, #tpu.memory_space<vmem>>, vector<1x224x224xf32>,
    %c0_26 = arith.constant 0 : index
    %c2 = arith.constant 2 : index
    %c0_27 = arith.constant 0 : index
    %c0_28 = arith.constant 0 : index
    %25 = vector.load %arg4[%c0_26, %c2, %c0_27, %c0_28] : memref<1x3x16x16xf32, #tpu.memory_space<vmem>>, vector<1x1x16x16xf32>
    %26 = vector.shape_cast %25 : vector<1x1x16x16xf32> to vector<16x16xf32>
    %cst_29 = arith.constant dense<0.000000e+00> : vector<16x224xf32>
    %27 = tpu.matmul %26, %4, %cst_29 {dimension_numbers = #tpu.dot_dimension_numbers<[1], [0], [0], [1], [0, 0, 1, 1], [], []>} : vector<16x16xf32>, vector<16x224xf32>, vector<16x224xf32> -> vector<16x224xf32>
    %c2_30 = arith.constant 2 : index
    %c0_31 = arith.constant 0 : index
    %c0_32 = arith.constant 0 : index
    %28 = vector.load %arg6[%c2_30, %c0_31, %c0_32] : memref<3x224x224xf32, #tpu.memory_space<vmem>>, vector<1x224x224xf32>
    %29 = vector.shape_cast %28 : vector<1x224x224xf32> to vector<224x224xf32>
    %cst_33 = arith.constant dense<0.000000e+00> : vector<224x224xf32>
    %30 = tpu.matmul %3, %27, %cst_33 {dimension_numbers = #tpu.dot_dimension_numbers<[0], [0], [1], [1], [0, 1, 1, 1], [], []>} : vector<16x224xf32>, vector<16x224xf32>, vector<224x224xf32> -> vector<224x224xf32>
    %31 = arith.addf %29, %30 : vector<224x224xf32>
    %c2_34 = arith.constant 2 : index
    %c0_35 = arith.constant 0 : index
    %c0_36 = arith.constant 0 : index
    %32 = vector.load %arg6[%c2_34, %c0_35, %c0_36] : memref<3x224x224xf32, #tpu.memory_space<vmem>>, vector<1x224x224xf32>
    %33 = vector.shape_cast %32 : vector<1x224x224xf32> to vector<224x224xf32>
    %34 = vector.shape_cast %31 : vector<224x224xf32> to vector<1x224x224xf32>
    tpu.vector_store %arg6[%c2_34, %c0_35, %c0_36], %34 {strides = array<i32>} : memref<3x224x224xf32, #tpu.memory_space<vmem>>, vector<1x224x224xf32>,
    %c0_i32_37 = arith.constant 0 : i32
    %35 = arith.cmpi eq, %arg1, %c0_i32_37 : i32
    %36 = arith.extui %35 : i1 to i32
    %c0_i32_38 = arith.constant 0 : i32
    %37 = arith.cmpi ne, %36, %c0_i32_38 : i32
    scf.if %37 {
      %c0_39 = arith.constant 0 : index
      %c0_40 = arith.constant 0 : index
      %c0_41 = arith.constant 0 : index
      %38 = vector.load %arg6[%c0_39, %c0_40, %c0_41] : memref<3x224x224xf32, #tpu.memory_space<vmem>>, vector<1x224x224xf32>
      %39 = vector.shape_cast %38 : vector<1x224x224xf32> to vector<224x224xf32>
      %cst_42 = arith.constant 131.091202 : f32
      %40 = vector.broadcast %cst_42 : f32 to vector<224x224xf32>
      %41 = arith.subf %39, %40 : vector<224x224xf32>
      %c0_43 = arith.constant 0 : index
      %c0_44 = arith.constant 0 : index
      %c0_45 = arith.constant 0 : index
      %c0_46 = arith.constant 0 : index
      %42 = vector.load %arg5[%c0_43, %c0_44, %c0_45, %c0_46] : memref<1x3x224x224xf32, #tpu.memory_space<vmem>>, vector<1x1x224x224xf32>
      %43 = vector.shape_cast %42 : vector<1x1x224x224xf32> to vector<224x224xf32>
      %44 = vector.shape_cast %41 : vector<224x224xf32> to vector<1x1x224x224xf32>
      tpu.vector_store %arg5[%c0_43, %c0_44, %c0_45, %c0_46], %44 {strides = array<i32>} : memref<1x3x224x224xf32, #tpu.memory_space<vmem>>, vector<1x1x224x224xf32>,
      %c1_47 = arith.constant 1 : index
      %c0_48 = arith.constant 0 : index
      %c0_49 = arith.constant 0 : index
      %45 = vector.load %arg6[%c1_47, %c0_48, %c0_49] : memref<3x224x224xf32, #tpu.memory_space<vmem>>, vector<1x224x224xf32>
      %46 = vector.shape_cast %45 : vector<1x224x224xf32> to vector<224x224xf32>
      %cst_50 = arith.constant 103.882698 : f32
      %47 = vector.broadcast %cst_50 : f32 to vector<224x224xf32>
      %48 = arith.subf %46, %47 : vector<224x224xf32>
      %c0_51 = arith.constant 0 : index
      %c1_52 = arith.constant 1 : index
      %c0_53 = arith.constant 0 : index
      %c0_54 = arith.constant 0 : index
      %49 = vector.load %arg5[%c0_51, %c1_52, %c0_53, %c0_54] : memref<1x3x224x224xf32, #tpu.memory_space<vmem>>, vector<1x1x224x224xf32>
      %50 = vector.shape_cast %49 : vector<1x1x224x224xf32> to vector<224x224xf32>
      %51 = vector.shape_cast %48 : vector<224x224xf32> to vector<1x1x224x224xf32>
      tpu.vector_store %arg5[%c0_51, %c1_52, %c0_53, %c0_54], %51 {strides = array<i32>} : memref<1x3x224x224xf32, #tpu.memory_space<vmem>>, vector<1x1x224x224xf32>,
      %c2_55 = arith.constant 2 : index
      %c0_56 = arith.constant 0 : index
      %c0_57 = arith.constant 0 : index
      %52 = vector.load %arg6[%c2_55, %c0_56, %c0_57] : memref<3x224x224xf32, #tpu.memory_space<vmem>>, vector<1x224x224xf32>
      %53 = vector.shape_cast %52 : vector<1x224x224xf32> to vector<224x224xf32>
      %cst_58 = arith.constant 9.149530e+01 : f32
      %54 = vector.broadcast %cst_58 : f32 to vector<224x224xf32>
      %55 = arith.subf %53, %54 : vector<224x224xf32>
      %c0_59 = arith.constant 0 : index
      %c2_60 = arith.constant 2 : index
      %c0_61 = arith.constant 0 : index
      %c0_62 = arith.constant 0 : index
      %56 = vector.load %arg5[%c0_59, %c2_60, %c0_61, %c0_62] : memref<1x3x224x224xf32, #tpu.memory_space<vmem>>, vector<1x1x224x224xf32>
      %57 = vector.shape_cast %56 : vector<1x1x224x224xf32> to vector<224x224xf32>
      %58 = vector.shape_cast %55 : vector<224x224xf32> to vector<1x1x224x224xf32>
      tpu.vector_store %arg5[%c0_59, %c2_60, %c0_61, %c0_62], %58 {strides = array<i32>} : memref<1x3x224x224xf32, #tpu.memory_space<vmem>>, vector<1x1x224x224xf32>,
    } else {
    }
    return
  }
  func.func @transform_0(%arg0: i32, %arg1: i32) -> (i32, i32) {
    %c0_i32 = arith.constant 0 : i32
    %c0_i32_0 = arith.constant 0 : i32
    return %arg1, %c0_i32 : i32, i32
  }
  func.func @transform_1(%arg0: i32, %arg1: i32) -> (i32, i32) {
    %c0_i32 = arith.constant 0 : i32
    %c0_i32_0 = arith.constant 0 : i32
    %c0_i32_1 = arith.constant 0 : i32
    return %c0_i32, %c0_i32_0 : i32, i32
  }
  func.func @transform_2(%arg0: i32, %arg1: i32) -> (i32, i32, i32, i32) {
    %c0_i32 = arith.constant 0 : i32
    %c0_i32_0 = arith.constant 0 : i32
    %c0_i32_1 = arith.constant 0 : i32
    return %arg0, %c0_i32, %arg1, %c0_i32_0 : i32, i32, i32, i32
  }
  func.func @transform_3(%arg0: i32, %arg1: i32) -> (i32, i32, i32, i32) {
    %c0_i32 = arith.constant 0 : i32
    %c0_i32_0 = arith.constant 0 : i32
    %c0_i32_1 = arith.constant 0 : i32
    %c0_i32_2 = arith.constant 0 : i32
    return %arg0, %c0_i32, %c0_i32_0, %c0_i32_1 : i32, i32, i32, i32
  }
}

</mosaic_0001>

<bundles_post_ra>
// kernel: tpu_custom_call.1
= control target key start
LH: loop header
LB: loop body
LE: loop exit
PB: predicated region body
PF: predicated region fallthrough
CT: control target
= control target key end

     0   :  { %8 = vsyncpa [#allocation4], 0  ;;  %s4477_s0 = inlined_call_operand.hbm [shape: f32[16,224], index: 0, kind: input, shape index: {}]   ;;  %s4478_s1 = inlined_call_operand.hbm [shape: f32[16,224], index: 1, kind: input, shape index: {}]   ;;  %s4479_s2 = inlined_call_operand.hbm [shape: f32[2,3,16,16], index: 2, kind: input, shape index: {}]   ;;  %s4480_s3 = inlined_call_operand.hbm [shape: f32[2,3,224,224], index: 3, kind: output, shape index: {}]  }
   0x1   :  { %9 = vsyncpa [#allocation7], 0 }
   0x2   :  { %10 = vsyncpa [#allocation5], 0 }
   0x3   :  { %12 = vsyncpa [#allocation5 + $0x1], 0  ;;  %s3381_s12 = smov 0   ;;  %s3383_s13 = smov 0  }
   0x4   :  { %s3385_s14 = smov 0   ;;  %s3387_s15 = smov 0  }
   0x5   :  { %s3389_s16 = smov 0   ;;  %s3391_s17 = smov 0  }
   0x6 LB: > { %s3412_s18 = sadd.s32 4294967295, %s3348_s17   ;;  %s2665_s19 = sadd.s32 4294967294, %s3348_s17   ;;  %s3348_s17 = sphi %s3391_s17, %s18_s17   ;;  %s3344_s16 = sphi %s3389_s16, %s4503_s16   ;;  %s3340_s15 = sphi %s3387_s15, %s4502_s15   ;;  %s3336_s14 = sphi %s3385_s14, %s4501_s14   ;;  %s3332_s13 = sphi %s3383_s13, %s4500_s13   ;;  %s3328_s12 = sphi %s3381_s12, %s4499_s12  }
   0x7   : > { %s86_s20 = sadd.s32 1, %s3336_s14  ;;  %p93_p0 = scmp.ne.s32.totalorder %s3336_s14, %s3332_s13 }
   0x8   : > { %p94_p1 = scmp.eq.s32.totalorder %s3348_s17, 0  ;;  %p99_p2 = scmp.ne.s32.totalorder %s3332_s13, %s3328_s12 }
   0x9   : > { %p4481_p3 = scmp.eq.s32.totalorder %s3412_s18, 0  ;;  %p123_p4 = scmp.eq.s32.totalorder %s3412_s18, 1 }
   0xa   : > { %p3423_p5 = por %p94_p1, %p93_p0  ;;  %p129_p6 = scmp.eq.s32.totalorder %s2665_s19, 1 }
   0xb   : > { %p3429_p7 = por %p4481_p3, %p99_p2  ;;  %p3433_p8 = por %p123_p4, %p93_p0 }
   0xc   : > { %p3437_p9 = por %p129_p6, %p99_p2  ;;  %p2666_p10 = scmp.ge.s32.totalorder %s3348_s17, 1 }
   0xd   : > { %s4485_s22 = scalar_select %p3429_p7, 1, 0 }
   0xe   : > { %s4486_s23 = scalar_select %p3433_p8, 1, 0 }
   0xf   : > { %s4487_s24 = scalar_select %p3437_p9, 1, 0 }
  0x10   : > { %p136_p11 = scmp.lt.s32.totalorder %s3348_s17, 3  ;;  %s3350_s26 = smov [#allocation3]  }
  0x11   : > { %s152_s27 = sshll.u32 %s3350_s26, 4  ;;  %p3111_p1 = scmp.lt.s32.totalorder %s3348_s17, 2  ;;  %s3447_s27 = int_to_ptr.vmem [resolvable:$true] %s152_s27 }
  0x12   : > { %p3443_p12 = pnand %p2666_p10, %p136_p11  ;;  %s3351_s29 = smov [#allocation6]  }
  0x13   : > { %s165_s30 = sshll.u32 %s3351_s29, 4  ;;  %p3461_p4 = pnand %p3111_p1, %p3423_p5  ;;  %s3465_s30 = int_to_ptr.vmem [resolvable:$true] %s165_s30 }
  0x14   : > { %p3094_p13 = pneg %p3443_p12  ;;  %s3172_s7 = scalar_lea.hbm %s4477_s0, 512 }
  0x15   : > { %p3173_p6 = scmp.ne.s32.totalorder %s4477_s0, %s3172_s7  ;;  %p3179_p5 = scmp.lt.u32.totalorder %s3172_s7, %s4477_s0 }
  0x16   : > { %p3455_p2 = pnand %p3094_p13, %p4481_p3 }
  0x18   : > { %p3174_p10 = pneg %p3455_p2 }
  0x1a   : > { %p3175_p11 = pnand %p3174_p10, %p3173_p6 }
  0x1c   : > { %p3176_p13 = pneg %p3175_p11 }
  0x1e   : > { %p3181_p1 = pnand %p3179_p5, %p3176_p13 }
  0x20   : > { %3184 = shalt.err (!%p3181_p1)
}
  0x21   : > { %s3185_s19 = scalar_lea.vmem %s3447_s27, 512  ;;  %p3193_p8 = scmp.lt.s32.totalorder %s3447_s27, %s3447_s27 }
  0x22   : > { %p3186_p0 = scmp.ne.s32.totalorder %s3447_s27, %s3185_s19  ;;  %p3194_p6 = scmp.lt.s32.totalorder %s3185_s19, %s3185_s19 }
  0x24   : > { %p3188_p3 = pnand %p3186_p0, %p3174_p10  ;;  %p3195_p11 = por %p3194_p6, %p3193_p8 }
  0x26   : > { %p3189_p9 = pneg %p3188_p3 }
  0x28   : > { %p3196_p7 = pnand %p3195_p11, %p3189_p9 }
  0x2a   : > { %3199 = shalt.err (!%p3196_p7)
}
  0x2b   : > { %s3352_s21 = smov 256   ;;  %s3353_s26 = smov 16  }
  0x2c   : > { %3097 = dma.hbm_to_vmem [thread:$0]  (!%p3455_p2), %s4477_s0, 512, %s3447_s27, [#allocation4], %s3352_s21, %s3352_s21, %s3353_s26  }
  0x2d   : > { %s3200_s8 = scalar_lea.hbm %s4478_s1, 512 }
  0x2e   : > { %p3201_p3 = scmp.ne.s32.totalorder %s4478_s1, %s3200_s8  ;;  %p3207_p9 = scmp.lt.u32.totalorder %s3200_s8, %s4478_s1 }
  0x30   : > { %p3203_p7 = pnand %p3201_p3, %p3174_p10 }
  0x32   : > { %p3204_p8 = pneg %p3203_p7 }
  0x34   : > { %p3209_p0 = pnand %p3207_p9, %p3204_p8 }
  0x36   : > { %3212 = shalt.err (!%p3209_p0)
}
  0x37   : > { %s3213_s27 = scalar_lea.vmem %s3465_s30, 512  ;;  %p3221_p6 = scmp.lt.s32.totalorder %s3465_s30, %s3465_s30 }
  0x38   : > { %p3214_p13 = scmp.ne.s32.totalorder %s3465_s30, %s3213_s27  ;;  %p3222_p11 = scmp.lt.s32.totalorder %s3213_s27, %s3213_s27 }
  0x3a   : > { %p3216_p5 = pnand %p3214_p13, %p3174_p10  ;;  %p3223_p3 = por %p3222_p11, %p3221_p6 }
  0x3c   : > { %p3217_p1 = pneg %p3216_p5 }
  0x3e   : > { %p3224_p7 = pnand %p3223_p3, %p3217_p1 }
  0x40   : > { %3227 = shalt.err (!%p3224_p7)
}
  0x41   : > { %3100 = dma.hbm_to_vmem [thread:$0]  (!%p3455_p2), %s4478_s1, 512, %s3465_s30, [#allocation7], %s3352_s21, %s3352_s21, %s3353_s26  }
  0x42   : > { %s30_s6 = sadd.s32 1, %s3344_s16  ;;  %s179_s7 = sand.u32 1, %s3348_s17  }
  0x43   : > { %p32_p10 = scmp.ge.s32.totalorder %s30_s6, 2  ;;  %s181_s8 = sand.u32 1, %s3336_s14  }
  0x44   : > { %s3078_s9 = smul.u32 768, %s3344_s16  ;;  %s3539_s29 = scalar_lea.sflag [#allocation4], %s179_s7 }
  0x45   : > { %s4505_s6 = smov (%p32_p10, %s30_s6), 0  ;;  %s3077_s28 = smul.u32 48, %s181_s8 }
  0x46   : > { %s3528_s19 = scalar_lea.hbm %s4479_s2, %s3078_s9  ;;  %s81_s30 = ssub.s32 %s3344_s16, %s4505_s6 }
  0x47   : > { %p84_p2 = scmp.eq.s32.totalorder %s81_s30, 0  ;;  %s183_s21 = scalar_lea.vmem [#allocation8], %s3077_s28 }
  0x48   : > { %s192_s26 = sshll.u32 %s183_s21, 4  ;;  %s3228_s5 = scalar_lea.hbm %s3528_s19, 768  ;;  %s3537_s26 = int_to_ptr.vmem [resolvable:$true] %s192_s26 }
  0x49   : > { %s3535_s27 = scalar_select %p84_p2, %s3336_s14, %s86_s20  }
  0x4a   : > { %p3229_p8 = scmp.ne.s32.totalorder %s3528_s19, %s3228_s5  ;;  %p3230_p9 = pneg %p3461_p4 }
  0x4b   : > { %s3233_s28 = scalar_lea.hbm %s4479_s2, 1536  ;;  %p3234_p5 = scmp.lt.u32.totalorder %s3528_s19, %s4479_s2 }
  0x4c   : > { %p3231_p0 = pnand %p3230_p9, %p3229_p8  ;;  %p3235_p1 = scmp.lt.u32.totalorder %s3233_s28, %s3228_s5 }
  0x4d   : > { %p3237_p11 = scmp.lt.u32.totalorder %s3228_s5, %s3528_s19 }
  0x4e   : > { %p3232_p13 = pneg %p3231_p0  ;;  %p3236_p6 = por %p3235_p1, %p3234_p5 }
  0x50   : > { %p3238_p3 = por %p3237_p11, %p3236_p6 }
  0x52   : > { %p3239_p7 = pnand %p3238_p3, %p3232_p13 }
  0x54   : > { %3242 = shalt.err (!%p3239_p7)
}
  0x55   : > { %s3243_s20 = scalar_lea.vmem %s3537_s26, 768  ;;  %s3354_s7 = smov [#allocation8]  }
  0x56   : > { %p3244_p10 = scmp.ne.s32.totalorder %s3537_s26, %s3243_s20  ;;  %s3248_s30 = sshll.u32 %s3354_s7, 4  ;;  %s3249_s30 = int_to_ptr.vmem [resolvable:$false] %s3248_s30 }
  0x57   : > { %s3250_s21 = scalar_lea.vmem %s3249_s30, 1536  ;;  %p3251_p0 = scmp.lt.s32.totalorder %s3537_s26, %s3249_s30 }
  0x58   : > { %p3246_p2 = pnand %p3244_p10, %p3230_p9  ;;  %p3252_p5 = scmp.lt.s32.totalorder %s3250_s21, %s3243_s20 }
  0x5a   : > { %p3247_p8 = pneg %p3246_p2  ;;  %p3253_p1 = por %p3252_p5, %p3251_p0 }
  0x5c   : > { %p3254_p6 = pnand %p3253_p1, %p3247_p8 }
  0x5e   : > { %3257 = shalt.err (!%p3254_p6)
}
  0x5f   : > { %s3355_s5 = smov 128   ;;  %s3356_s8 = smov 8  }
  0x60   : > { %3104 = dma.hbm_to_vmem [thread:$0]  (!%p3461_p4), %s3528_s19, 768, %s3537_s26, %s3539_s29, %s3355_s5, %s3355_s5, %s3356_s8  }
  0x61   : > { %204 = sbr.rel (%p3443_p12) target bundleno = 974 (0x3ce), region = 32  ;;  %p4491_p9 = scmp.eq.s32.totalorder (!%p3443_p12), %s3412_s18, 0 }
  0x68   : > { %3311 = dma.done.wait (%p4491_p9), [#allocation4], 512   ;;  %p4492_p13 = pmov %p4491_p9 }
  0x69   : > { %p4493_p11 = pmov %p4491_p9 }
  0x6a   : > { %3313 = vsyncadd (%p4492_p13), [#allocation4], 4294966784 }
  0x6b   : > { %3315 = dma.done.wait (%p4493_p11), [#allocation7], 512   ;;  %p4494_p3 = pmov %p4491_p9 }
  0x6c   : > { %s214_s4 = sand.u32 1, %s3412_s18   ;;  %s3579_s19 = sand.u32 1, %s3332_s13  }
  0x6d   : > { %3317 = vsyncadd (%p4494_p3), [#allocation7], 4294966784  ;;  %s3079_s25 = smul.u32 48, %s3579_s19  ;;  %s215_s26 = scalar_lea.sflag [#allocation4], %s214_s4 }
  0x6e   : > { %p4495_p12 = scmp.ne.s32.totalorder %s4485_s22, 0 }
  0x6f   : > { %s3582_s29 = scalar_lea.vmem [#allocation8], %s3079_s25 }
  0x70   : > { %3319 = dma.done.wait (%p4495_p12), %s215_s26, 768  }
  0x71   : > { %3321 = vsyncadd (%p4495_p12), %s215_s26, 4294966528  ;;  %v3357_v0 = vmov 0.0   ;;  %v421_v1 = vld [vmem:[#allocation6 + $0x8] sm:$0xff]  ;;  %v423_v2 = vld [vmem:[#allocation6 + $0x18] sm:$0xff]  ;;  %vm426_vm0 = vcmask 130048   ;;  %vm248_vm1 = vcmask 785408  }
  0x72   : > { %497 = vmatprep.mubr.f32.mxu0 %v3357_v0  ;;  %856 = vmatprep.mubr.f32.mxu1 %v3357_v0  ;;  %v420_v3 = vld [vmem:[#allocation6] sm:$0xff]  ;;  %v3051_v4 = vpack.c.bf16 %v423_v2, %v421_v1  ;;  %v422_v5 = vld [vmem:[#allocation6 + $0x10] sm:$0xff]  ;;  %v417_v8 = vld [vmem:[#allocation3 + $0x8] sm:$0xff]  ;;  %249 = vst.msk [vmem:[#allocation2 + $0x8] sm:$0xff] %vm248_vm1, %v3357_v0  ;;  %s3080_s18 = smul.u32 1344, %s3579_s19  ;;  %s2546_s7 = scalar_lea.sflag [#allocation5], %s3579_s19 }
  0x73   : > { %v3053_v6 = vpack.c.bf16 %v422_v5, %v420_v3  ;;  %v416_v7 = vld [vmem:[#allocation3] sm:$0xff]  ;;  %v418_v10 = vld [vmem:[#allocation3 + $0x10] sm:$0xff]  ;;  %598 = vxpose.xlu1.b32.start [1/2] (short) (narrow) %v417_v8, 96  ;;  %v419_v11 = vld [vmem:[#allocation3 + $0x18] sm:$0xff]  ;;  %251 = vst.msk [vmem:[#allocation2 + $0x18] sm:$0xff] %vm248_vm1, %v3357_v0  ;;  %s3081_s9 = smul.u32 21504, %s3340_s15 }
  0x74   : > { %3052 = vmatprep.subr.bf16.mxu0 %v3051_v4  ;;  %566 = vxpose.xlu0.b32.start [1/2] (short) %v416_v7, 128  ;;  %v424_v9 = vld [vmem:[%s3582_s29] sm:$0xff]  ;;  %v425_v12 = vld [vmem:[%s3582_s29 + $0x8] sm:$0xff]  ;;  %v2704_v46 = vld [vmem:[%s3582_s29 + $0x10] sm:$0xff]  ;;  %253 = vst.msk [vmem:[#allocation2 + $0x28] sm:$0xff] %vm248_vm1, %v3357_v0  ;;  %s3919_s22 = scalar_lea.vmem [#allocation9], %s3080_s18  ;;  %p4496_p7 = scmp.ne.s32.totalorder %s4486_s23, 0 }
  0x75   : > { %3054 = vmatpush1.bf16.msra.mxu0 %v3053_v6  ;;  %v2705_v48 = vld [vmem:[%s3582_s29 + $0x18] sm:$0xff]  ;;  %v2736_v49 = vld [vmem:[%s3582_s29 + $0x20] sm:$0xff]  ;;  %v2737_v50 = vld [vmem:[%s3582_s29 + $0x28] sm:$0xff]  ;;  %255 = vst.msk [vmem:[#allocation2 + $0x38] sm:$0xff] %vm248_vm1, %v3357_v0  ;;  %s2559_s28 = sshll.u32 %s3919_s22, 4  ;;  %s4424_s20 = scalar_lea.hbm %s4480_s3, %s3081_s9  ;;  %s4426_s28 = int_to_ptr.vmem [resolvable:$true] %s2559_s28 }
  0x76   : > { %257 = vst.msk [vmem:[#allocation2 + $0x48] sm:$0xff] %vm248_vm1, %v3357_v0  ;;  %259 = vst.msk [vmem:[#allocation2 + $0x58] sm:$0xff] %vm248_vm1, %v3357_v0  ;;  %s3258_s15 = scalar_lea.vmem %s4426_s28, 21504  ;;  %s3358_s30 = smov [#allocation9]  }
  0x77   : > { %599 = vxpose.xlu1.b32.end [2/2] (short) (narrow) %v419_v11, 96  ;;  %261 = vst.msk [vmem:[#allocation2 + $0x68] sm:$0xff] %vm248_vm1, %v3357_v0  ;;  %263 = vst.msk [vmem:[#allocation2 + $0x78] sm:$0xff] %vm248_vm1, %v3357_v0  ;;  %p3259_p4 = scmp.ne.s32.totalorder %s4426_s28, %s3258_s15  ;;  %s3262_s21 = sshll.u32 %s3358_s30, 4  ;;  %s3263_s21 = int_to_ptr.vmem [resolvable:$false] %s3262_s21 }
  0x78   : > { %2674 = vmatmul.mubr.msk.f32.vlgmr.msra.gmra.mrb[0].mxu0 %vm426_vm0, %v424_v9  ;;  %567 = vxpose.xlu0.b32.end [2/2] (short) %v418_v10, 128  ;;  %265 = vst.msk [vmem:[#allocation2 + $0x88] sm:$0xff] %vm248_vm1, %v3357_v0  ;;  %267 = vst.msk [vmem:[#allocation2 + $0x98] sm:$0xff] %vm248_vm1, %v3357_v0  ;;  %s3264_s5 = scalar_lea.vmem %s3263_s21, 43008  ;;  %p3265_p8 = scmp.lt.s32.totalorder %s4426_s28, %s3263_s21 }
  0x79   : > { %503 = vmatprep.mubr.f32.mxu0 %v3357_v0  ;;  %269 = vst.msk [vmem:[#allocation2 + $0xa8] sm:$0xff] %vm248_vm1, %v3357_v0  ;;  %271 = vst.msk [vmem:[#allocation2 + $0xb8] sm:$0xff] %vm248_vm1, %v3357_v0  ;;  %v511_v51 = vld [vmem:[#allocation2 + $0x8] sm:$0xff]  ;;  %p3260_p10 = pnand %p3259_p4, %p4496_p7  ;;  %p3266_p0 = scmp.lt.s32.totalorder %s3264_s5, %s3258_s15 }
  0x7a   : > { %273 = vst.msk [vmem:[#allocation2 + $0xc8] sm:$0xff] %vm248_vm1, %v3357_v0  ;;  %275 = vst.msk [vmem:[#allocation2 + $0xd8] sm:$0xff] %vm248_vm1, %v3357_v0  ;;  %v513_v61 = vld [vmem:[#allocation2 + $0x18] sm:$0xff] }
  0x7b   : > { %277 = vst.msk [vmem:[#allocation2 + $0xe8] sm:$0xff] %vm248_vm1, %v3357_v0  ;;  %279 = vst.msk [vmem:[#allocation2 + $0xf8] sm:$0xff] %vm248_vm1, %v3357_v0  ;;  %v515_v8 = vld [vmem:[#allocation2 + $0x28] sm:$0xff]  ;;  %p3261_p2 = pneg %p3260_p10  ;;  %p3267_p5 = por %p3266_p0, %p3265_p8 }
  0x7c   : > { %2675 = vmatmul.mubr.msk.f32.gmra.mrb[2].mxu0 %vm426_vm0, %v425_v12  ;;  %281 = vst.msk [vmem:[#allocation2 + $0x108] sm:$0xff] %vm248_vm1, %v3357_v0  ;;  %283 = vst.msk [vmem:[#allocation2 + $0x118] sm:$0xff] %vm248_vm1, %v3357_v0 }
  0x7d   : > { %778 = vmatprep.mubr.f32.mxu0 %v3357_v0  ;;  %285 = vst.msk [vmem:[#allocation2 + $0x128] sm:$0xff] %vm248_vm1, %v3357_v0  ;;  %287 = vst.msk [vmem:[#allocation2 + $0x138] sm:$0xff] %vm248_vm1, %v3357_v0  ;;  %p3268_p1 = pnand %p3267_p5, %p3261_p2 }
  0x7e   : > { %289 = vst.msk [vmem:[#allocation2 + $0x148] sm:$0xff] %vm248_vm1, %v3357_v0  ;;  %291 = vst.msk [vmem:[#allocation2 + $0x158] sm:$0xff] %vm248_vm1, %v3357_v0 }
  0x7f   : > { %293 = vst.msk [vmem:[#allocation2 + $0x168] sm:$0xff] %vm248_vm1, %v3357_v0  ;;  %295 = vst.msk [vmem:[#allocation2 + $0x178] sm:$0xff] %vm248_vm1, %v3357_v0 }
  0x80   : > { %297 = vst.msk [vmem:[#allocation2 + $0x188] sm:$0xff] %vm248_vm1, %v3357_v0  ;;  %299 = vst.msk [vmem:[#allocation2 + $0x198] sm:$0xff] %vm248_vm1, %v3357_v0 }
  0x81   : > { %301 = vst.msk [vmem:[#allocation2 + $0x1a8] sm:$0xff] %vm248_vm1, %v3357_v0  ;;  %303 = vst.msk [vmem:[#allocation2 + $0x1b8] sm:$0xff] %vm248_vm1, %v3357_v0  ;;  %v537_v52 = vld [vmem:[#allocation2 + $0xd8] sm:$0xff] }
  0x82   : > { %305 = vst.msk [vmem:[#allocation2 + $0x1c8] sm:$0xff] %vm248_vm1, %v3357_v0  ;;  %307 = vst.msk [vmem:[#allocation2 + $0x1d8] sm:$0xff] %vm248_vm1, %v3357_v0  ;;  %v539_v62 = vld [vmem:[#allocation2 + $0xe8] sm:$0xff]  ;;  %v541_v9 = vld [vmem:[#allocation2 + $0xf8] sm:$0xff] }
  0x83   : > { %309 = vst.msk [vmem:[#allocation2 + $0x1e8] sm:$0xff] %vm248_vm1, %v3357_v0  ;;  %311 = vst.msk [vmem:[#allocation2 + $0x1f8] sm:$0xff] %vm248_vm1, %v3357_v0 }
  0x84   : > { %313 = vst.msk [vmem:[#allocation2 + $0x208] sm:$0xff] %vm248_vm1, %v3357_v0  ;;  %315 = vst.msk [vmem:[#allocation2 + $0x218] sm:$0xff] %vm248_vm1, %v3357_v0 }
  0x85   : > { %317 = vst.msk [vmem:[#allocation2 + $0x228] sm:$0xff] %vm248_vm1, %v3357_v0  ;;  %319 = vst.msk [vmem:[#allocation2 + $0x238] sm:$0xff] %vm248_vm1, %v3357_v0 }
  0x86   : > { %321 = vst.msk [vmem:[#allocation2 + $0x248] sm:$0xff] %vm248_vm1, %v3357_v0  ;;  %323 = vst.msk [vmem:[#allocation2 + $0x258] sm:$0xff] %vm248_vm1, %v3357_v0 }
  0x87   : > { %325 = vst.msk [vmem:[#allocation2 + $0x268] sm:$0xff] %vm248_vm1, %v3357_v0  ;;  %327 = vst.msk [vmem:[#allocation2 + $0x278] sm:$0xff] %vm248_vm1, %v3357_v0 }
  0x88   : > { %329 = vst.msk [vmem:[#allocation2 + $0x288] sm:$0xff] %vm248_vm1, %v3357_v0  ;;  %331 = vst.msk [vmem:[#allocation2 + $0x298] sm:$0xff] %vm248_vm1, %v3357_v0 }
  0x89   : > { %333 = vst.msk [vmem:[#allocation2 + $0x2a8] sm:$0xff] %vm248_vm1, %v3357_v0  ;;  %335 = vst.msk [vmem:[#allocation2 + $0x2b8] sm:$0xff] %vm248_vm1, %v3357_v0 }
  0x8a   : > { %337 = vst.msk [vmem:[#allocation2 + $0x2c8] sm:$0xff] %vm248_vm1, %v3357_v0  ;;  %339 = vst.msk [vmem:[#allocation2 + $0x2d8] sm:$0xff] %vm248_vm1, %v3357_v0 }
  0x8b   : > { %341 = vst.msk [vmem:[#allocation2 + $0x2e8] sm:$0xff] %vm248_vm1, %v3357_v0  ;;  %343 = vst.msk [vmem:[#allocation2 + $0x2f8] sm:$0xff] %vm248_vm1, %v3357_v0 }
  0x8c   : > { %345 = vst.msk [vmem:[#allocation2 + $0x308] sm:$0xff] %vm248_vm1, %v3357_v0  ;;  %347 = vst.msk [vmem:[#allocation2 + $0x318] sm:$0xff] %vm248_vm1, %v3357_v0 }
  0x8d   : > { %349 = vst.msk [vmem:[#allocation2 + $0x328] sm:$0xff] %vm248_vm1, %v3357_v0  ;;  %351 = vst.msk [vmem:[#allocation2 + $0x338] sm:$0xff] %vm248_vm1, %v3357_v0 }
  0x8e   : > { %353 = vst.msk [vmem:[#allocation2 + $0x348] sm:$0xff] %vm248_vm1, %v3357_v0  ;;  %355 = vst.msk [vmem:[#allocation2 + $0x358] sm:$0xff] %vm248_vm1, %v3357_v0 }
  0x8f   : > { %357 = vst.msk [vmem:[#allocation2 + $0x368] sm:$0xff] %vm248_vm1, %v3357_v0  ;;  %359 = vst.msk [vmem:[#allocation2 + $0x378] sm:$0xff] %vm248_vm1, %v3357_v0 }
  0x90   : > { %361 = vst.msk [vmem:[#allocation2 + $0x388] sm:$0xff] %vm248_vm1, %v3357_v0  ;;  %363 = vst.msk [vmem:[#allocation2 + $0x398] sm:$0xff] %vm248_vm1, %v3357_v0 }
  0x91   : > { %365 = vst.msk [vmem:[#allocation2 + $0x3a8] sm:$0xff] %vm248_vm1, %v3357_v0  ;;  %367 = vst.msk [vmem:[#allocation2 + $0x3b8] sm:$0xff] %vm248_vm1, %v3357_v0 }
  0x92   : > { %369 = vst.msk [vmem:[#allocation2 + $0x3c8] sm:$0xff] %vm248_vm1, %v3357_v0  ;;  %371 = vst.msk [vmem:[#allocation2 + $0x3d8] sm:$0xff] %vm248_vm1, %v3357_v0 }
  0x93   : > { %373 = vst.msk [vmem:[#allocation2 + $0x3e8] sm:$0xff] %vm248_vm1, %v3357_v0  ;;  %375 = vst.msk [vmem:[#allocation2 + $0x3f8] sm:$0xff] %vm248_vm1, %v3357_v0 }
  0x94   : > { %377 = vst.msk [vmem:[#allocation2 + $0x408] sm:$0xff] %vm248_vm1, %v3357_v0  ;;  %379 = vst.msk [vmem:[#allocation2 + $0x418] sm:$0xff] %vm248_vm1, %v3357_v0 }
  0x95   : > { %381 = vst.msk [vmem:[#allocation2 + $0x428] sm:$0xff] %vm248_vm1, %v3357_v0  ;;  %383 = vst.msk [vmem:[#allocation2 + $0x438] sm:$0xff] %vm248_vm1, %v3357_v0 }
  0x96   : > { %385 = vst.msk [vmem:[#allocation2 + $0x448] sm:$0xff] %vm248_vm1, %v3357_v0  ;;  %387 = vst.msk [vmem:[#allocation2 + $0x458] sm:$0xff] %vm248_vm1, %v3357_v0 }
  0x97   : > { %389 = vst.msk [vmem:[#allocation2 + $0x468] sm:$0xff] %vm248_vm1, %v3357_v0  ;;  %391 = vst.msk [vmem:[#allocation2 + $0x478] sm:$0xff] %vm248_vm1, %v3357_v0 }
  0x98   : > { %393 = vst.msk [vmem:[#allocation2 + $0x488] sm:$0xff] %vm248_vm1, %v3357_v0  ;;  %395 = vst.msk [vmem:[#allocation2 + $0x498] sm:$0xff] %vm248_vm1, %v3357_v0 }
  0x99   : > { %397 = vst.msk [vmem:[#allocation2 + $0x4a8] sm:$0xff] %vm248_vm1, %v3357_v0  ;;  %399 = vst.msk [vmem:[#allocation2 + $0x4b8] sm:$0xff] %vm248_vm1, %v3357_v0 }
  0x9a   : > { %401 = vst.msk [vmem:[#allocation2 + $0x4c8] sm:$0xff] %vm248_vm1, %v3357_v0  ;;  %403 = vst.msk [vmem:[#allocation2 + $0x4d8] sm:$0xff] %vm248_vm1, %v3357_v0 }
  0x9b   : > { %405 = vst.msk [vmem:[#allocation2 + $0x4e8] sm:$0xff] %vm248_vm1, %v3357_v0  ;;  %407 = vst.msk [vmem:[#allocation2 + $0x4f8] sm:$0xff] %vm248_vm1, %v3357_v0 }
  0x9c   : > { %409 = vst.msk [vmem:[#allocation2 + $0x508] sm:$0xff] %vm248_vm1, %v3357_v0  ;;  %411 = vst.msk [vmem:[#allocation2 + $0x518] sm:$0xff] %vm248_vm1, %v3357_v0 }
  0x9d   : > { %413 = vst.msk [vmem:[#allocation2 + $0x528] sm:$0xff] %vm248_vm1, %v3357_v0  ;;  %415 = vst.msk [vmem:[#allocation2 + $0x538] sm:$0xff] %vm248_vm1, %v3357_v0 }
  0xf3   : > { %v3620_v25 = vpop.trf.xlu1 }
  0xf4   : > { %v3596_v13 = vpop.trf.xlu0 }
  0xf7   : > { %v3624_v30 = vpop.trf.xlu1 }
  0xf8   : > { %v3598_v14 = vpop.trf.xlu0 }
  0xfb   : > { %v3630_v36 = vpop.trf.xlu1 }
  0xfc   : > { %v3600_v15 = vpop.trf.xlu0 }
  0xff   : > { %v3646_v38 = vpop.trf.xlu1 }
 0x100   : > { %v3602_v16 = vpop.trf.xlu0 }
 0x103   : > { %v3654_v39 = vpop.trf.xlu1 }
 0x104   : > { %v3604_v17 = vpop.trf.xlu0 }
 0x107   : > { %v3668_v40 = vpop.trf.xlu1 }
 0x108   : > { %v3606_v18 = vpop.trf.xlu0 }
 0x10b   : > { %v3676_v41 = vpop.trf.xlu1 }
 0x10c   : > { %v3608_v19 = vpop.trf.xlu0 }
 0x10f   : > { %v3690_v42 = vpop.trf.xlu1 }
 0x110   : > { %v3610_v20 = vpop.trf.xlu0 }
 0x113   : > { %v3698_v43 = vpop.trf.xlu1 }
 0x114   : > { %v3612_v21 = vpop.trf.xlu0 }
 0x117   : > { %v3712_v44 = vpop.trf.xlu1 }
 0x118   : > { %v3614_v22 = vpop.trf.xlu0 }
 0x11b   : > { %v3720_v45 = vpop.trf.xlu1 }
 0x11c   : > { %v3616_v23 = vpop.trf.xlu0 }
 0x11f   : > { %v3732_v47 = vpop.trf.xlu1 }
 0x120   : > { %v3618_v24 = vpop.trf.xlu0 }
 0x124   : > { %v3622_v26 = vpop.trf.xlu0 }
 0x128   : > { %v3626_v33 = vpop.trf.xlu0 }
 0x12c   : > { %v3628_v35 = vpop.trf.xlu0 }
 0x130   : > { %v3644_v37 = vpop.trf.xlu0 }
 0x14b   : > { %v499_v27 = vpop.f32.mrb[0].mxu0 }
 0x14c   : > { %v501_v28 = vpop.f32.mrb[1].mxu0 }
 0x14f   : > { %v505_v29 = vpop.f32.mrb[2].mxu0 }
 0x150   : > { %v3057_v31 = vpack.c.bf16 %v505_v29, %v499_v27  ;;  %v507_v32 = vpop.f32.mrb[3].mxu0 }
 0x151   : > { %v3055_v34 = vpack.c.bf16 %v507_v32, %v501_v28  ;;  %v543_v32 = vld [vmem:[#allocation2 + $0x108] sm:$0xff] }
 0x153   : > { %3056 = vmatprep.subr.bf16.mxu0 %v3055_v34  ;;  %3075 = vmatprep.subr.bf16.mxu1 %v3055_v34 }
 0x154   : > { %3058 = vmatpush1.bf16.msra.mxu0 %v3057_v31  ;;  %3076 = vmatpush1.bf16.msra.mxu1 %v3057_v31  ;;  %v517_v31 = vld [vmem:[#allocation2 + $0x38] sm:$0xff] }
 0x155   : > { %3068 = vmatprep.subr.bf16.mxu1 %v3051_v4  ;;  %3060 = vmatprep.subr.bf16.mxu0 %v3051_v4 }
 0x157   : > { %2676 = vmatmul.mubr.msk.f32.vlgmr.msra.gmra.mrb[4].mxu0 %vm426_vm0, %v3596_v13  ;;  %2689 = vmatmul.mubr.msk.f32.vlgmr.msra.gmra.mrb[0].mxu1 %vm426_vm0, %v3626_v33 }
 0x158   : > { %784 = vmatprep.mubr.f32.mxu0 %v3357_v0  ;;  %862 = vmatprep.mubr.f32.mxu1 %v3357_v0 }
 0x159   : > { %3070 = vmatpush1.bf16.msra.mxu1 %v3053_v6  ;;  %3062 = vmatpush1.bf16.msra.mxu0 %v3053_v6 }
 0x15b   : > { %2677 = vmatmul.mubr.msk.f32.gmra.mrb[6].mxu0 %vm426_vm0, %v3598_v14  ;;  %2690 = vmatmul.mubr.msk.f32.gmra.mrb[2].mxu1 %vm426_vm0, %v3628_v35 }
 0x15c   : > { %790 = vmatprep.mubr.f32.mxu0 %v3357_v0  ;;  %868 = vmatprep.mubr.f32.mxu1 %v3357_v0 }
 0x15f   : > { %2678 = vmatmul.mubr.msk.f32.gmra.mrb[8].mxu0 %vm426_vm0, %v3600_v15  ;;  %2691 = vmatmul.mubr.msk.f32.gmra.mrb[4].mxu1 %vm426_vm0, %v3644_v37 }
 0x160   : > { %796 = vmatprep.mubr.f32.mxu0 %v3357_v0  ;;  %874 = vmatprep.mubr.f32.mxu1 %v3357_v0 }
 0x163   : > { %2679 = vmatmul.mubr.msk.f32.gmra.mrb[10].mxu0 %vm426_vm0, %v3602_v16  ;;  %2692 = vmatmul.mubr.msk.f32.gmra.mrb[6].mxu1 %vm426_vm0, %v3620_v25 }
 0x164   : > { %802 = vmatprep.mubr.f32.mxu0 %v3357_v0  ;;  %880 = vmatprep.mubr.f32.mxu1 %v3357_v0 }
 0x167   : > { %2680 = vmatmul.mubr.msk.f32.gmra.mrb[12].mxu0 %vm426_vm0, %v3604_v17  ;;  %2693 = vmatmul.mubr.msk.f32.gmra.mrb[8].mxu1 %vm426_vm0, %v3624_v30 }
 0x168   : > { %808 = vmatprep.mubr.f32.mxu0 %v3357_v0  ;;  %886 = vmatprep.mubr.f32.mxu1 %v3357_v0 }
 0x16b   : > { %2681 = vmatmul.mubr.msk.f32.gmra.mrb[14].mxu0 %vm426_vm0, %v3606_v18  ;;  %2694 = vmatmul.mubr.msk.f32.gmra.mrb[10].mxu1 %vm426_vm0, %v3630_v36 }
 0x16c   : > { %814 = vmatprep.mubr.f32.mxu0 %v3357_v0  ;;  %892 = vmatprep.mubr.f32.mxu1 %v3357_v0 }
 0x16f   : > { %2682 = vmatmul.mubr.msk.f32.gmra.mrb[16].mxu0 %vm426_vm0, %v3608_v19  ;;  %2695 = vmatmul.mubr.msk.f32.gmra.mrb[12].mxu1 %vm426_vm0, %v3646_v38 }
 0x170   : > { %820 = vmatprep.mubr.f32.mxu0 %v3357_v0  ;;  %898 = vmatprep.mubr.f32.mxu1 %v3357_v0 }
 0x173   : > { %2683 = vmatmul.mubr.msk.f32.gmra.mrb[18].mxu0 %vm426_vm0, %v3610_v20  ;;  %2696 = vmatmul.mubr.msk.f32.gmra.mrb[14].mxu1 %vm426_vm0, %v3654_v39 }
 0x174   : > { %826 = vmatprep.mubr.f32.mxu0 %v3357_v0  ;;  %904 = vmatprep.mubr.f32.mxu1 %v3357_v0 }
 0x177   : > { %2684 = vmatmul.mubr.msk.f32.gmra.mrb[20].mxu0 %vm426_vm0, %v3612_v21  ;;  %2697 = vmatmul.mubr.msk.f32.gmra.mrb[16].mxu1 %vm426_vm0, %v3668_v40 }
 0x178   : > { %832 = vmatprep.mubr.f32.mxu0 %v3357_v0  ;;  %910 = vmatprep.mubr.f32.mxu1 %v3357_v0 }
 0x17b   : > { %2685 = vmatmul.mubr.msk.f32.gmra.mrb[22].mxu0 %vm426_vm0, %v3614_v22  ;;  %2698 = vmatmul.mubr.msk.f32.gmra.mrb[18].mxu1 %vm426_vm0, %v3676_v41 }
 0x17c   : > { %838 = vmatprep.mubr.f32.mxu0 %v3357_v0  ;;  %916 = vmatprep.mubr.f32.mxu1 %v3357_v0 }
 0x17f   : > { %2686 = vmatmul.mubr.msk.f32.gmra.mrb[24].mxu0 %vm426_vm0, %v3616_v23  ;;  %2699 = vmatmul.mubr.msk.f32.gmra.mrb[20].mxu1 %vm426_vm0, %v3690_v42 }
 0x180   : > { %844 = vmatprep.mubr.f32.mxu0 %v3357_v0  ;;  %922 = vmatprep.mubr.f32.mxu1 %v3357_v0 }
 0x183   : > { %2687 = vmatmul.mubr.msk.f32.gmra.mrb[26].mxu0 %vm426_vm0, %v3618_v24  ;;  %2700 = vmatmul.mubr.msk.f32.gmra.mrb[22].mxu1 %vm426_vm0, %v3698_v43 }
 0x184   : > { %850 = vmatprep.mubr.f32.mxu0 %v3357_v0  ;;  %928 = vmatprep.mubr.f32.mxu1 %v3357_v0 }
 0x187   : > { %2688 = vmatmul.mubr.msk.f32.gmra.mrb[28].mxu0 %vm426_vm0, %v3622_v26  ;;  %2701 = vmatmul.mubr.msk.f32.gmra.mrb[24].mxu1 %vm426_vm0, %v3712_v44 }
 0x188   : > { %934 = vmatprep.mubr.f32.mxu1 %v3357_v0  ;;  %1133 = vmatprep.mubr.f32.mxu0 %v3357_v0 }
 0x18b   : > { %2702 = vmatmul.mubr.msk.f32.gmra.mrb[26].mxu1 %vm426_vm0, %v3720_v45  ;;  %2706 = vmatmul.mubr.msk.f32.vlgmr.msra.gmra.mrb[30].mxu0 %vm426_vm0, %v2704_v46 }
 0x18c   : > { %940 = vmatprep.mubr.f32.mxu1 %v3357_v0  ;;  %1139 = vmatprep.mubr.f32.mxu0 %v3357_v0 }
 0x18f   : > { %2703 = vmatmul.mubr.msk.f32.gmra.mrb[28].mxu1 %vm426_vm0, %v3732_v47  ;;  %2707 = vmatmul.mubr.msk.f32.gmra.mrb[32].mxu0 %vm426_vm0, %v2705_v48 }
 0x190   : > { %1621 = vmatprep.mubr.f32.mxu1 %v3357_v0  ;;  %1267 = vmatprep.mubr.f32.mxu0 %v3357_v0 }
 0x193   : > { %2738 = vmatmul.mubr.msk.f32.vlgmr.msra.gmra.mrb[30].mxu1 %vm426_vm0, %v2736_v49 }
 0x194   : > { %1627 = vmatprep.mubr.f32.mxu1 %v3357_v0 }
 0x197   : > { %2739 = vmatmul.mubr.msk.f32.gmra.mrb[32].mxu1 %vm426_vm0, %v2737_v50 }
 0x198   : > { %1755 = vmatprep.mubr.f32.mxu1 %v3357_v0 }
 0x22a   : > { %v780_v53 = vpop.f32.mrb[4].mxu0  ;;  %v858_v54 = vpop.f32.mrb[0].mxu1 }
 0x22b   : > { %v782_v55 = vpop.f32.mrb[5].mxu0  ;;  %v860_v56 = vpop.f32.mrb[1].mxu1  ;;  %v2768_v59 = vadd.f32 -131.0912, %v780_v53  ;;  %v2794_v60 = vadd.f32 -131.0912, %v858_v54 }
 0x22c   : > { %v948_v57 = vadd.f32 %v782_v55, %v511_v51  ;;  %v974_v58 = vadd.f32 %v860_v56, %v537_v52 }
 0x22d   : > { %2151 = vst [vmem:[%s3919_s22] sm:$0xff] %v2768_v59  ;;  %2177 = vst [vmem:[%s3919_s22 + $0xd0] sm:$0xff] %v2794_v60  ;;  %v545_v59 = vld [vmem:[#allocation2 + $0x118] sm:$0xff] }
 0x22e   : > { %1005 = vst.msk [vmem:[#allocation2 + $0x8] sm:$0xff] %vm248_vm1, %v948_v57  ;;  %1031 = vst.msk [vmem:[#allocation2 + $0xd8] sm:$0xff] %vm248_vm1, %v974_v58  ;;  %v786_v63 = vpop.f32.mrb[6].mxu0  ;;  %v864_v1 = vpop.f32.mrb[2].mxu1  ;;  %v519_v58 = vld [vmem:[#allocation2 + $0x48] sm:$0xff] }
 0x22f   : > { %v788_v2 = vpop.f32.mrb[7].mxu0  ;;  %v866_v3 = vpop.f32.mrb[3].mxu1  ;;  %v2770_v6 = vadd.f32 -131.0912, %v786_v63  ;;  %v2796_v7 = vadd.f32 -131.0912, %v864_v1 }
 0x230   : > { %v950_v4 = vadd.f32 %v788_v2, %v513_v61  ;;  %v976_v5 = vadd.f32 %v866_v3, %v539_v62 }
 0x231   : > { %2153 = vst [vmem:[%s3919_s22 + $0x10] sm:$0xff] %v2770_v6  ;;  %2179 = vst [vmem:[%s3919_s22 + $0xe0] sm:$0xff] %v2796_v7 }
 0x232   : > { %1007 = vst.msk [vmem:[#allocation2 + $0x18] sm:$0xff] %vm248_vm1, %v950_v4  ;;  %1033 = vst.msk [vmem:[#allocation2 + $0xe8] sm:$0xff] %vm248_vm1, %v976_v5  ;;  %v792_v10 = vpop.f32.mrb[8].mxu0  ;;  %v870_v11 = vpop.f32.mrb[4].mxu1 }
 0x233   : > { %v794_v12 = vpop.f32.mrb[9].mxu0  ;;  %v872_v27 = vpop.f32.mrb[5].mxu1  ;;  %v2772_v48 = vadd.f32 -131.0912, %v792_v10  ;;  %v2798_v49 = vadd.f32 -131.0912, %v870_v11 }
 0x234   : > { %v952_v28 = vadd.f32 %v794_v12, %v515_v8  ;;  %v978_v29 = vadd.f32 %v872_v27, %v541_v9  ;;  %v521_v9 = vld [vmem:[#allocation2 + $0x58] sm:$0xff]  ;;  %v547_v10 = vld [vmem:[#allocation2 + $0x128] sm:$0xff] }
 0x235   : > { %v2040_v34 = vld [vmem:[#allocation2 + $0x8] sm:$0xff]  ;;  %v2066_v46 = vld [vmem:[#allocation2 + $0xd8] sm:$0xff]  ;;  %2155 = vst [vmem:[%s3919_s22 + $0x20] sm:$0xff] %v2772_v48  ;;  %2181 = vst [vmem:[%s3919_s22 + $0xf0] sm:$0xff] %v2798_v49 }
 0x236   : > { %v2769_v50 = vadd.f32 -131.0912, %v2040_v34  ;;  %v2795_v51 = vadd.f32 -131.0912, %v2066_v46  ;;  %1009 = vst.msk [vmem:[#allocation2 + $0x28] sm:$0xff] %vm248_vm1, %v952_v28  ;;  %1035 = vst.msk [vmem:[#allocation2 + $0xf8] sm:$0xff] %vm248_vm1, %v978_v29 }
 0x237   : > { %v798_v52 = vpop.f32.mrb[10].mxu0  ;;  %v876_v53 = vpop.f32.mrb[6].mxu1 }
 0x238   : > { %v800_v54 = vpop.f32.mrb[11].mxu0  ;;  %v878_v55 = vpop.f32.mrb[7].mxu1  ;;  %2152 = vst.msk [vmem:[%s3919_s22 + $0x8] sm:$0xff] %vm248_vm1, %v2769_v50  ;;  %2178 = vst.msk [vmem:[%s3919_s22 + $0xd8] sm:$0xff] %vm248_vm1, %v2795_v51  ;;  %v2774_v62 = vadd.f32 -131.0912, %v798_v52 }
 0x239   : > { %v954_v56 = vadd.f32 %v800_v54, %v517_v31  ;;  %v980_v57 = vadd.f32 %v878_v55, %v543_v32  ;;  %v2042_v60 = vld [vmem:[#allocation2 + $0x18] sm:$0xff]  ;;  %v2068_v61 = vld [vmem:[#allocation2 + $0xe8] sm:$0xff]  ;;  %v2800_v63 = vadd.f32 -131.0912, %v876_v53 }
 0x23a   : > { %v2771_v1 = vadd.f32 -131.0912, %v2042_v60  ;;  %v2797_v2 = vadd.f32 -131.0912, %v2068_v61  ;;  %v804_v3 = vpop.f32.mrb[12].mxu0  ;;  %v882_v4 = vpop.f32.mrb[8].mxu1 }
 0x23b   : > { %1011 = vst.msk [vmem:[#allocation2 + $0x38] sm:$0xff] %vm248_vm1, %v954_v56  ;;  %1037 = vst.msk [vmem:[#allocation2 + $0x108] sm:$0xff] %vm248_vm1, %v980_v57  ;;  %v806_v5 = vpop.f32.mrb[13].mxu0  ;;  %v884_v6 = vpop.f32.mrb[9].mxu1  ;;  %v2776_v27 = vadd.f32 -131.0912, %v804_v3 }
 0x23c   : > { %2157 = vst [vmem:[%s3919_s22 + $0x30] sm:$0xff] %v2774_v62  ;;  %2183 = vst [vmem:[%s3919_s22 + $0x100] sm:$0xff] %v2800_v63  ;;  %v956_v7 = vadd.f32 %v806_v5, %v519_v58  ;;  %v982_v8 = vadd.f32 %v884_v6, %v545_v59  ;;  %v2802_v28 = vadd.f32 -131.0912, %v882_v4  ;;  %v523_v51 = vld [vmem:[#allocation2 + $0x68] sm:$0xff]  ;;  %v549_v52 = vld [vmem:[#allocation2 + $0x138] sm:$0xff] }
 0x23d   : > { %2154 = vst.msk [vmem:[%s3919_s22 + $0x18] sm:$0xff] %vm248_vm1, %v2771_v1  ;;  %2180 = vst.msk [vmem:[%s3919_s22 + $0xe8] sm:$0xff] %vm248_vm1, %v2797_v2  ;;  %v2044_v11 = vld [vmem:[#allocation2 + $0x28] sm:$0xff]  ;;  %v2070_v12 = vld [vmem:[#allocation2 + $0xf8] sm:$0xff] }
 0x23e   : > { %v2773_v29 = vadd.f32 -131.0912, %v2044_v11  ;;  %v2799_v31 = vadd.f32 -131.0912, %v2070_v12  ;;  %1013 = vst.msk [vmem:[#allocation2 + $0x48] sm:$0xff] %vm248_vm1, %v956_v7  ;;  %1039 = vst.msk [vmem:[#allocation2 + $0x118] sm:$0xff] %vm248_vm1, %v982_v8 }
 0x23f   : > { %v810_v32 = vpop.f32.mrb[14].mxu0  ;;  %v888_v34 = vpop.f32.mrb[10].mxu1  ;;  %2159 = vst [vmem:[%s3919_s22 + $0x40] sm:$0xff] %v2776_v27  ;;  %2185 = vst [vmem:[%s3919_s22 + $0x110] sm:$0xff] %v2802_v28  ;;  %v525_v2 = vld [vmem:[#allocation2 + $0x78] sm:$0xff]  ;;  %v551_v3 = vld [vmem:[#allocation2 + $0x148] sm:$0xff] }
 0x240   : > { %v812_v46 = vpop.f32.mrb[15].mxu0  ;;  %v890_v48 = vpop.f32.mrb[11].mxu1  ;;  %2156 = vst.msk [vmem:[%s3919_s22 + $0x28] sm:$0xff] %vm248_vm1, %v2773_v29  ;;  %2182 = vst.msk [vmem:[%s3919_s22 + $0xf8] sm:$0xff] %vm248_vm1, %v2799_v31  ;;  %v2778_v55 = vadd.f32 -131.0912, %v810_v32 }
 0x241   : > { %v958_v49 = vadd.f32 %v812_v46, %v521_v9  ;;  %v984_v50 = vadd.f32 %v890_v48, %v547_v10  ;;  %v2804_v56 = vadd.f32 -131.0912, %v888_v34  ;;  %v527_v31 = vld [vmem:[#allocation2 + $0x88] sm:$0xff]  ;;  %v553_v32 = vld [vmem:[#allocation2 + $0x158] sm:$0xff] }
 0x242   : > { %v2046_v53 = vld [vmem:[#allocation2 + $0x38] sm:$0xff]  ;;  %v2072_v54 = vld [vmem:[#allocation2 + $0x108] sm:$0xff]  ;;  %v816_v59 = vpop.f32.mrb[16].mxu0  ;;  %v894_v60 = vpop.f32.mrb[12].mxu1  ;;  %2161 = vst [vmem:[%s3919_s22 + $0x50] sm:$0xff] %v2778_v55 }
 0x243   : > { %v2775_v57 = vadd.f32 -131.0912, %v2046_v53  ;;  %v2801_v58 = vadd.f32 -131.0912, %v2072_v54  ;;  %1015 = vst.msk [vmem:[#allocation2 + $0x58] sm:$0xff] %vm248_vm1, %v958_v49  ;;  %1041 = vst.msk [vmem:[#allocation2 + $0x128] sm:$0xff] %vm248_vm1, %v984_v50 }
 0x244   : > { %2187 = vst [vmem:[%s3919_s22 + $0x120] sm:$0xff] %v2804_v56  ;;  %v818_v61 = vpop.f32.mrb[17].mxu0  ;;  %v896_v62 = vpop.f32.mrb[13].mxu1  ;;  %v2780_v6 = vadd.f32 -131.0912, %v816_v59  ;;  %v555_v59 = vld [vmem:[#allocation2 + $0x168] sm:$0xff] }
 0x245   : > { %2158 = vst.msk [vmem:[%s3919_s22 + $0x38] sm:$0xff] %vm248_vm1, %v2775_v57  ;;  %2184 = vst.msk [vmem:[%s3919_s22 + $0x108] sm:$0xff] %vm248_vm1, %v2801_v58  ;;  %v960_v63 = vadd.f32 %v818_v61, %v523_v51  ;;  %v986_v1 = vadd.f32 %v896_v62, %v549_v52  ;;  %v2048_v4 = vld [vmem:[#allocation2 + $0x48] sm:$0xff]  ;;  %v2074_v5 = vld [vmem:[#allocation2 + $0x118] sm:$0xff]  ;;  %v2806_v7 = vadd.f32 -131.0912, %v894_v60 }
 0x246   : > { %v2777_v8 = vadd.f32 -131.0912, %v2048_v4  ;;  %v2803_v9 = vadd.f32 -131.0912, %v2074_v5  ;;  %v822_v10 = vpop.f32.mrb[18].mxu0  ;;  %v900_v11 = vpop.f32.mrb[14].mxu1 }
 0x247   : > { %1017 = vst.msk [vmem:[#allocation2 + $0x68] sm:$0xff] %vm248_vm1, %v960_v63  ;;  %1043 = vst.msk [vmem:[#allocation2 + $0x138] sm:$0xff] %vm248_vm1, %v986_v1  ;;  %v824_v12 = vpop.f32.mrb[19].mxu0  ;;  %v902_v27 = vpop.f32.mrb[15].mxu1  ;;  %v2782_v48 = vadd.f32 -131.0912, %v822_v10 }
 0x248   : > { %2163 = vst [vmem:[%s3919_s22 + $0x60] sm:$0xff] %v2780_v6  ;;  %2189 = vst [vmem:[%s3919_s22 + $0x130] sm:$0xff] %v2806_v7  ;;  %v962_v28 = vadd.f32 %v824_v12, %v525_v2  ;;  %v988_v29 = vadd.f32 %v902_v27, %v551_v3  ;;  %v2808_v49 = vadd.f32 -131.0912, %v900_v11  ;;  %v529_v58 = vld [vmem:[#allocation2 + $0x98] sm:$0xff] }
 0x249   : > { %2160 = vst.msk [vmem:[%s3919_s22 + $0x48] sm:$0xff] %vm248_vm1, %v2777_v8  ;;  %2186 = vst.msk [vmem:[%s3919_s22 + $0x118] sm:$0xff] %vm248_vm1, %v2803_v9  ;;  %v531_v9 = vld [vmem:[#allocation2 + $0xa8] sm:$0xff]  ;;  %v557_v10 = vld [vmem:[#allocation2 + $0x178] sm:$0xff] }
 0x24a   : > { %v2050_v34 = vld [vmem:[#allocation2 + $0x58] sm:$0xff]  ;;  %v2076_v46 = vld [vmem:[#allocation2 + $0x128] sm:$0xff]  ;;  %1019 = vst.msk [vmem:[#allocation2 + $0x78] sm:$0xff] %vm248_vm1, %v962_v28  ;;  %1045 = vst.msk [vmem:[#allocation2 + $0x148] sm:$0xff] %vm248_vm1, %v988_v29  ;;  %v828_v52 = vpop.f32.mrb[20].mxu0  ;;  %v906_v53 = vpop.f32.mrb[16].mxu1 }
 0x24b   : > { %v2779_v50 = vadd.f32 -131.0912, %v2050_v34  ;;  %v2805_v51 = vadd.f32 -131.0912, %v2076_v46  ;;  %2165 = vst [vmem:[%s3919_s22 + $0x70] sm:$0xff] %v2782_v48  ;;  %2191 = vst [vmem:[%s3919_s22 + $0x140] sm:$0xff] %v2808_v49 }
 0x24c   : > { %v830_v54 = vpop.f32.mrb[21].mxu0  ;;  %v908_v55 = vpop.f32.mrb[17].mxu1  ;;  %v2784_v62 = vadd.f32 -131.0912, %v828_v52  ;;  %v2810_v63 = vadd.f32 -131.0912, %v906_v53 }
 0x24d   : > { %2162 = vst.msk [vmem:[%s3919_s22 + $0x58] sm:$0xff] %vm248_vm1, %v2779_v50  ;;  %2188 = vst.msk [vmem:[%s3919_s22 + $0x128] sm:$0xff] %vm248_vm1, %v2805_v51  ;;  %v964_v56 = vadd.f32 %v830_v54, %v527_v31  ;;  %v990_v57 = vadd.f32 %v908_v55, %v553_v32  ;;  %v533_v51 = vld [vmem:[#allocation2 + $0xb8] sm:$0xff]  ;;  %v559_v52 = vld [vmem:[#allocation2 + $0x188] sm:$0xff] }
 0x24e   : > { %v2052_v60 = vld [vmem:[#allocation2 + $0x68] sm:$0xff]  ;;  %v2078_v61 = vld [vmem:[#allocation2 + $0x138] sm:$0xff]  ;;  %v834_v3 = vpop.f32.mrb[22].mxu0  ;;  %v912_v4 = vpop.f32.mrb[18].mxu1  ;;  %2167 = vst [vmem:[%s3919_s22 + $0x80] sm:$0xff] %v2784_v62  ;;  %2193 = vst [vmem:[%s3919_s22 + $0x150] sm:$0xff] %v2810_v63 }
 0x24f   : > { %v2781_v1 = vadd.f32 -131.0912, %v2052_v60  ;;  %v2807_v2 = vadd.f32 -131.0912, %v2078_v61  ;;  %1021 = vst.msk [vmem:[#allocation2 + $0x88] sm:$0xff] %vm248_vm1, %v964_v56  ;;  %1047 = vst.msk [vmem:[#allocation2 + $0x158] sm:$0xff] %vm248_vm1, %v990_v57 }
 0x250   : > { %v836_v5 = vpop.f32.mrb[23].mxu0  ;;  %v914_v6 = vpop.f32.mrb[19].mxu1  ;;  %v2786_v27 = vadd.f32 -131.0912, %v834_v3  ;;  %v2812_v28 = vadd.f32 -131.0912, %v912_v4 }
 0x251   : > { %2164 = vst.msk [vmem:[%s3919_s22 + $0x68] sm:$0xff] %vm248_vm1, %v2781_v1  ;;  %2190 = vst.msk [vmem:[%s3919_s22 + $0x138] sm:$0xff] %vm248_vm1, %v2807_v2  ;;  %v966_v7 = vadd.f32 %v836_v5, %v529_v58  ;;  %v992_v8 = vadd.f32 %v914_v6, %v555_v59  ;;  %v2054_v11 = vld [vmem:[#allocation2 + $0x78] sm:$0xff]  ;;  %v2080_v12 = vld [vmem:[#allocation2 + $0x148] sm:$0xff] }
 0x252   : > { %v2783_v29 = vadd.f32 -131.0912, %v2054_v11  ;;  %v2809_v31 = vadd.f32 -131.0912, %v2080_v12  ;;  %v840_v32 = vpop.f32.mrb[24].mxu0  ;;  %v918_v34 = vpop.f32.mrb[20].mxu1 }
 0x253   : > { %1023 = vst.msk [vmem:[#allocation2 + $0x98] sm:$0xff] %vm248_vm1, %v966_v7  ;;  %1049 = vst.msk [vmem:[#allocation2 + $0x168] sm:$0xff] %vm248_vm1, %v992_v8  ;;  %v842_v46 = vpop.f32.mrb[25].mxu0  ;;  %v920_v48 = vpop.f32.mrb[21].mxu1  ;;  %v2788_v55 = vadd.f32 -131.0912, %v840_v32 }
 0x254   : > { %2169 = vst [vmem:[%s3919_s22 + $0x90] sm:$0xff] %v2786_v27  ;;  %2195 = vst [vmem:[%s3919_s22 + $0x160] sm:$0xff] %v2812_v28  ;;  %v968_v49 = vadd.f32 %v842_v46, %v531_v9  ;;  %v994_v50 = vadd.f32 %v920_v48, %v557_v10  ;;  %v2814_v56 = vadd.f32 -131.0912, %v918_v34  ;;  %v535_v2 = vld [vmem:[#allocation2 + $0xc8] sm:$0xff]  ;;  %v561_v3 = vld [vmem:[#allocation2 + $0x198] sm:$0xff] }
 0x255   : > { %2166 = vst.msk [vmem:[%s3919_s22 + $0x78] sm:$0xff] %vm248_vm1, %v2783_v29  ;;  %2192 = vst.msk [vmem:[%s3919_s22 + $0x148] sm:$0xff] %vm248_vm1, %v2809_v31  ;;  %v563_v31 = vld [vmem:[#allocation2 + $0x1a8] sm:$0xff] }
 0x256   : > { %v2056_v53 = vld [vmem:[#allocation2 + $0x88] sm:$0xff]  ;;  %v2082_v54 = vld [vmem:[#allocation2 + $0x158] sm:$0xff]  ;;  %1025 = vst.msk [vmem:[#allocation2 + $0xa8] sm:$0xff] %vm248_vm1, %v968_v49  ;;  %1051 = vst.msk [vmem:[#allocation2 + $0x178] sm:$0xff] %vm248_vm1, %v994_v50  ;;  %v846_v59 = vpop.f32.mrb[26].mxu0  ;;  %v924_v60 = vpop.f32.mrb[22].mxu1 }
 0x257   : > { %v2785_v57 = vadd.f32 -131.0912, %v2056_v53  ;;  %v2811_v58 = vadd.f32 -131.0912, %v2082_v54  ;;  %2171 = vst [vmem:[%s3919_s22 + $0xa0] sm:$0xff] %v2788_v55  ;;  %2197 = vst [vmem:[%s3919_s22 + $0x170] sm:$0xff] %v2814_v56 }
 0x258   : > { %v848_v61 = vpop.f32.mrb[27].mxu0  ;;  %v926_v62 = vpop.f32.mrb[23].mxu1  ;;  %v2790_v6 = vadd.f32 -131.0912, %v846_v59  ;;  %v2816_v7 = vadd.f32 -131.0912, %v924_v60 }
 0x259   : > { %2168 = vst.msk [vmem:[%s3919_s22 + $0x88] sm:$0xff] %vm248_vm1, %v2785_v57  ;;  %2194 = vst.msk [vmem:[%s3919_s22 + $0x158] sm:$0xff] %vm248_vm1, %v2811_v58  ;;  %v970_v63 = vadd.f32 %v848_v61, %v533_v51  ;;  %v996_v1 = vadd.f32 %v926_v62, %v559_v52  ;;  %v565_v59 = vld [vmem:[#allocation2 + $0x1b8] sm:$0xff] }
 0x25a   : > { %v2058_v4 = vld [vmem:[#allocation2 + $0x98] sm:$0xff]  ;;  %v2084_v5 = vld [vmem:[#allocation2 + $0x168] sm:$0xff]  ;;  %v852_v10 = vpop.f32.mrb[28].mxu0  ;;  %v930_v11 = vpop.f32.mrb[24].mxu1  ;;  %2173 = vst [vmem:[%s3919_s22 + $0xb0] sm:$0xff] %v2790_v6  ;;  %2199 = vst [vmem:[%s3919_s22 + $0x180] sm:$0xff] %v2816_v7 }
 0x25b   : > { %v2787_v8 = vadd.f32 -131.0912, %v2058_v4  ;;  %v2813_v9 = vadd.f32 -131.0912, %v2084_v5  ;;  %1027 = vst.msk [vmem:[#allocation2 + $0xb8] sm:$0xff] %vm248_vm1, %v970_v63  ;;  %1053 = vst.msk [vmem:[#allocation2 + $0x188] sm:$0xff] %vm248_vm1, %v996_v1 }
 0x25c   : > { %v854_v12 = vpop.f32.mrb[29].mxu0  ;;  %v932_v27 = vpop.f32.mrb[25].mxu1  ;;  %v2792_v46 = vadd.f32 -131.0912, %v852_v10  ;;  %v2818_v48 = vadd.f32 -131.0912, %v930_v11 }
 0x25d   : > { %2170 = vst.msk [vmem:[%s3919_s22 + $0x98] sm:$0xff] %vm248_vm1, %v2787_v8  ;;  %2196 = vst.msk [vmem:[%s3919_s22 + $0x168] sm:$0xff] %vm248_vm1, %v2813_v9  ;;  %v972_v28 = vadd.f32 %v854_v12, %v535_v2  ;;  %v998_v29 = vadd.f32 %v932_v27, %v561_v3  ;;  %v2060_v32 = vld [vmem:[#allocation2 + $0xa8] sm:$0xff]  ;;  %v2086_v34 = vld [vmem:[#allocation2 + $0x178] sm:$0xff] }
 0x25e   : > { %v2789_v49 = vadd.f32 -131.0912, %v2060_v32  ;;  %v2815_v50 = vadd.f32 -131.0912, %v2086_v34  ;;  %v936_v51 = vpop.f32.mrb[26].mxu1  ;;  %v1135_v52 = vpop.f32.mrb[30].mxu0 }
 0x25f   : > { %1029 = vst.msk [vmem:[#allocation2 + $0xc8] sm:$0xff] %vm248_vm1, %v972_v28  ;;  %1055 = vst.msk [vmem:[#allocation2 + $0x198] sm:$0xff] %vm248_vm1, %v998_v29  ;;  %v938_v53 = vpop.f32.mrb[27].mxu1  ;;  %v1137_v54 = vpop.f32.mrb[31].mxu0  ;;  %v2820_v58 = vadd.f32 -131.0912, %v936_v51 }
 0x260   : > { %2175 = vst [vmem:[%s3919_s22 + $0xc0] sm:$0xff] %v2792_v46  ;;  %2201 = vst [vmem:[%s3919_s22 + $0x190] sm:$0xff] %v2818_v48  ;;  %v1000_v55 = vadd.f32 %v938_v53, %v563_v31 }
 0x261   : > { %2172 = vst.msk [vmem:[%s3919_s22 + $0xa8] sm:$0xff] %vm248_vm1, %v2789_v49  ;;  %2198 = vst.msk [vmem:[%s3919_s22 + $0x178] sm:$0xff] %vm248_vm1, %v2815_v50  ;;  %v1156_v50 = vld [vmem:[#allocation2 + $0x208] sm:$0xff] }
 0x262   : > { %v2062_v56 = vld [vmem:[#allocation2 + $0xb8] sm:$0xff]  ;;  %v2088_v57 = vld [vmem:[#allocation2 + $0x188] sm:$0xff]  ;;  %1057 = vst.msk [vmem:[#allocation2 + $0x1a8] sm:$0xff] %vm248_vm1, %v1000_v55  ;;  %v942_v62 = vpop.f32.mrb[28].mxu1  ;;  %v1141_v63 = vpop.f32.mrb[32].mxu0  ;;  %2203 = vst [vmem:[%s3919_s22 + $0x1a0] sm:$0xff] %v2820_v58 }
 0x263   : > { %v2791_v60 = vadd.f32 -131.0912, %v2062_v56  ;;  %v2817_v61 = vadd.f32 -131.0912, %v2088_v57  ;;  %v3065_v1 = vpack.c.bf16 %v1141_v63, %v1135_v52  ;;  %v944_v2 = vpop.f32.mrb[29].mxu1  ;;  %v1143_v3 = vpop.f32.mrb[33].mxu0 }
 0x264   : > { %v1002_v4 = vadd.f32 %v944_v2, %v565_v59  ;;  %v3063_v5 = vpack.c.bf16 %v1143_v3, %v1137_v54  ;;  %v2822_v8 = vadd.f32 -131.0912, %v942_v62  ;;  %v1640_v54 = vld [vmem:[#allocation2 + $0x3a8] sm:$0xff]  ;;  %v1158_v62 = vld [vmem:[#allocation2 + $0x218] sm:$0xff] }
 0x265   : > { %2174 = vst.msk [vmem:[%s3919_s22 + $0xb8] sm:$0xff] %vm248_vm1, %v2791_v60  ;;  %2200 = vst.msk [vmem:[%s3919_s22 + $0x188] sm:$0xff] %vm248_vm1, %v2817_v61  ;;  %v1642_v63 = vld [vmem:[#allocation2 + $0x3b8] sm:$0xff] }
 0x266   : > { %v2064_v6 = vld [vmem:[#allocation2 + $0xc8] sm:$0xff]  ;;  %v2090_v7 = vld [vmem:[#allocation2 + $0x198] sm:$0xff]  ;;  %1059 = vst.msk [vmem:[#allocation2 + $0x1b8] sm:$0xff] %vm248_vm1, %v1002_v4  ;;  %3064 = vmatprep.subr.bf16.mxu0 %v3063_v5  ;;  %v1623_v11 = vpop.f32.mrb[30].mxu1  ;;  %2205 = vst [vmem:[%s3919_s22 + $0x1b0] sm:$0xff] %v2822_v8 }
 0x267   : > { %v2793_v9 = vadd.f32 -131.0912, %v2064_v6  ;;  %v2819_v10 = vadd.f32 -131.0912, %v2090_v7  ;;  %3066 = vmatpush1.bf16.msra.mxu0 %v3065_v1  ;;  %v1625_v12 = vpop.f32.mrb[31].mxu1 }
 0x269   : > { %2176 = vst.msk [vmem:[%s3919_s22 + $0xc8] sm:$0xff] %vm248_vm1, %v2793_v9  ;;  %2202 = vst.msk [vmem:[%s3919_s22 + $0x198] sm:$0xff] %vm248_vm1, %v2819_v10  ;;  %v2092_v27 = vld [vmem:[#allocation2 + $0x1a8] sm:$0xff] }
 0x26a   : > { %v2821_v28 = vadd.f32 -131.0912, %v2092_v27  ;;  %2708 = vmatmul.mubr.msk.f32.vlgmr.msra.gmra.mrb[34].mxu0 %vm426_vm0, %v3596_v13  ;;  %v1629_v29 = vpop.f32.mrb[32].mxu1  ;;  %v1160_v27 = vld [vmem:[#allocation2 + $0x228] sm:$0xff] }
 0x26b   : > { %v3073_v31 = vpack.c.bf16 %v1629_v29, %v1623_v11  ;;  %v1631_v32 = vpop.f32.mrb[33].mxu1  ;;  %1273 = vmatprep.mubr.f32.mxu0 %v3357_v0 }
 0x26c   : > { %2204 = vst.msk [vmem:[%s3919_s22 + $0x1a8] sm:$0xff] %vm248_vm1, %v2821_v28  ;;  %v3071_v34 = vpack.c.bf16 %v1631_v32, %v1625_v12  ;;  %v1644_v28 = vld [vmem:[#allocation2 + $0x3c8] sm:$0xff] }
 0x26d   : > { %v2094_v46 = vld [vmem:[#allocation2 + $0x1b8] sm:$0xff] }
 0x26e   : > { %v2823_v48 = vadd.f32 -131.0912, %v2094_v46  ;;  %2709 = vmatmul.mubr.msk.f32.gmra.mrb[36].mxu0 %vm426_vm0, %v3598_v14  ;;  %3072 = vmatprep.subr.bf16.mxu1 %v3071_v34 }
 0x26f   : > { %3074 = vmatpush1.bf16.msra.mxu1 %v3073_v31  ;;  %1279 = vmatprep.mubr.f32.mxu0 %v3357_v0 }
 0x270   : > { %2206 = vst.msk [vmem:[%s3919_s22 + $0x1b8] sm:$0xff] %vm248_vm1, %v2823_v48 }
 0x272   : > { %2710 = vmatmul.mubr.msk.f32.gmra.mrb[38].mxu0 %vm426_vm0, %v3600_v15  ;;  %2740 = vmatmul.mubr.msk.f32.vlgmr.msra.gmra.mrb[34].mxu1 %vm426_vm0, %v3596_v13  ;;  %v1148_v13 = vld [vmem:[#allocation2 + $0x1c8] sm:$0xff] }
 0x273   : > { %1285 = vmatprep.mubr.f32.mxu0 %v3357_v0  ;;  %1761 = vmatprep.mubr.f32.mxu1 %v3357_v0 }
 0x276   : > { %2711 = vmatmul.mubr.msk.f32.gmra.mrb[40].mxu0 %vm426_vm0, %v3602_v16  ;;  %2741 = vmatmul.mubr.msk.f32.gmra.mrb[36].mxu1 %vm426_vm0, %v3598_v14 }
 0x277   : > { %1291 = vmatprep.mubr.f32.mxu0 %v3357_v0  ;;  %1767 = vmatprep.mubr.f32.mxu1 %v3357_v0 }
 0x27a   : > { %2712 = vmatmul.mubr.msk.f32.gmra.mrb[42].mxu0 %vm426_vm0, %v3604_v17  ;;  %2742 = vmatmul.mubr.msk.f32.gmra.mrb[38].mxu1 %vm426_vm0, %v3600_v15 }
 0x27b   : > { %1297 = vmatprep.mubr.f32.mxu0 %v3357_v0  ;;  %1773 = vmatprep.mubr.f32.mxu1 %v3357_v0 }
 0x27e   : > { %2713 = vmatmul.mubr.msk.f32.gmra.mrb[44].mxu0 %vm426_vm0, %v3606_v18  ;;  %2743 = vmatmul.mubr.msk.f32.gmra.mrb[40].mxu1 %vm426_vm0, %v3602_v16 }
 0x27f   : > { %1303 = vmatprep.mubr.f32.mxu0 %v3357_v0  ;;  %1779 = vmatprep.mubr.f32.mxu1 %v3357_v0 }
 0x282   : > { %2714 = vmatmul.mubr.msk.f32.gmra.mrb[46].mxu0 %vm426_vm0, %v3608_v19  ;;  %2744 = vmatmul.mubr.msk.f32.gmra.mrb[42].mxu1 %vm426_vm0, %v3604_v17 }
 0x283   : > { %1309 = vmatprep.mubr.f32.mxu0 %v3357_v0  ;;  %1785 = vmatprep.mubr.f32.mxu1 %v3357_v0 }
 0x286   : > { %2715 = vmatmul.mubr.msk.f32.gmra.mrb[48].mxu0 %vm426_vm0, %v3610_v20  ;;  %2745 = vmatmul.mubr.msk.f32.gmra.mrb[44].mxu1 %vm426_vm0, %v3606_v18  ;;  %v1150_v18 = vld [vmem:[#allocation2 + $0x1d8] sm:$0xff] }
 0x287   : > { %1315 = vmatprep.mubr.f32.mxu0 %v3357_v0  ;;  %1791 = vmatprep.mubr.f32.mxu1 %v3357_v0 }
 0x28a   : > { %2716 = vmatmul.mubr.msk.f32.gmra.mrb[50].mxu0 %vm426_vm0, %v3612_v21  ;;  %2746 = vmatmul.mubr.msk.f32.gmra.mrb[46].mxu1 %vm426_vm0, %v3608_v19 }
 0x28b   : > { %1321 = vmatprep.mubr.f32.mxu0 %v3357_v0  ;;  %1797 = vmatprep.mubr.f32.mxu1 %v3357_v0 }
 0x28e   : > { %2717 = vmatmul.mubr.msk.f32.gmra.mrb[52].mxu0 %vm426_vm0, %v3614_v22  ;;  %2747 = vmatmul.mubr.msk.f32.gmra.mrb[48].mxu1 %vm426_vm0, %v3610_v20 }
 0x28f   : > { %1327 = vmatprep.mubr.f32.mxu0 %v3357_v0  ;;  %1803 = vmatprep.mubr.f32.mxu1 %v3357_v0 }
 0x292   : > { %2718 = vmatmul.mubr.msk.f32.gmra.mrb[54].mxu0 %vm426_vm0, %v3616_v23  ;;  %2748 = vmatmul.mubr.msk.f32.gmra.mrb[50].mxu1 %vm426_vm0, %v3612_v21 }
 0x293   : > { %1333 = vmatprep.mubr.f32.mxu0 %v3357_v0  ;;  %1809 = vmatprep.mubr.f32.mxu1 %v3357_v0 }
 0x296   : > { %2719 = vmatmul.mubr.msk.f32.gmra.mrb[56].mxu0 %vm426_vm0, %v3618_v24  ;;  %2749 = vmatmul.mubr.msk.f32.gmra.mrb[52].mxu1 %vm426_vm0, %v3614_v22 }
 0x297   : > { %1339 = vmatprep.mubr.f32.mxu0 %v3357_v0  ;;  %1815 = vmatprep.mubr.f32.mxu1 %v3357_v0 }
 0x29a   : > { %2720 = vmatmul.mubr.msk.f32.gmra.mrb[58].mxu0 %vm426_vm0, %v3622_v26  ;;  %2750 = vmatmul.mubr.msk.f32.gmra.mrb[54].mxu1 %vm426_vm0, %v3616_v23  ;;  %v1152_v23 = vld [vmem:[#allocation2 + $0x1e8] sm:$0xff] }
 0x29b   : > { %1345 = vmatprep.mubr.f32.mxu0 %v3357_v0  ;;  %1821 = vmatprep.mubr.f32.mxu1 %v3357_v0 }
 0x29e   : > { %2721 = vmatmul.mubr.msk.f32.gmra.mrb[60].mxu0 %vm426_vm0, %v3626_v33  ;;  %2751 = vmatmul.mubr.msk.f32.gmra.mrb[56].mxu1 %vm426_vm0, %v3618_v24  ;;  %v1636_v24 = vld [vmem:[#allocation2 + $0x388] sm:$0xff] }
 0x29f   : > { %1351 = vmatprep.mubr.f32.mxu0 %v3357_v0  ;;  %1827 = vmatprep.mubr.f32.mxu1 %v3357_v0 }
 0x2a2   : > { %2722 = vmatmul.mubr.msk.f32.gmra.mrb[62].mxu0 %vm426_vm0, %v3628_v35  ;;  %2752 = vmatmul.mubr.msk.f32.gmra.mrb[58].mxu1 %vm426_vm0, %v3622_v26 }
 0x2a3   : > { %1357 = vmatprep.mubr.f32.mxu0 %v3357_v0  ;;  %1833 = vmatprep.mubr.f32.mxu1 %v3357_v0 }
 0x2a6   : > { %2723 = vmatmul.mubr.msk.f32.gmra.mrb[64].mxu0 %vm426_vm0, %v3644_v37  ;;  %2753 = vmatmul.mubr.msk.f32.gmra.mrb[60].mxu1 %vm426_vm0, %v3626_v33 }
 0x2a7   : > { %1363 = vmatprep.mubr.f32.mxu0 %v3357_v0  ;;  %1839 = vmatprep.mubr.f32.mxu1 %v3357_v0 }
 0x2aa   : > { %2724 = vmatmul.mubr.msk.f32.gmra.mrb[66].mxu0 %vm426_vm0, %v3620_v25  ;;  %2754 = vmatmul.mubr.msk.f32.gmra.mrb[62].mxu1 %vm426_vm0, %v3628_v35 }
 0x2ab   : > { %1369 = vmatprep.mubr.f32.mxu0 %v3357_v0  ;;  %1845 = vmatprep.mubr.f32.mxu1 %v3357_v0 }
 0x2ae   : > { %2725 = vmatmul.mubr.msk.f32.gmra.mrb[68].mxu0 %vm426_vm0, %v3624_v30  ;;  %2755 = vmatmul.mubr.msk.f32.gmra.mrb[64].mxu1 %vm426_vm0, %v3644_v37 }
 0x2af   : > { %1375 = vmatprep.mubr.f32.mxu0 %v3357_v0  ;;  %1851 = vmatprep.mubr.f32.mxu1 %v3357_v0 }
 0x2b2   : > { %2726 = vmatmul.mubr.msk.f32.gmra.mrb[70].mxu0 %vm426_vm0, %v3630_v36  ;;  %2756 = vmatmul.mubr.msk.f32.gmra.mrb[66].mxu1 %vm426_vm0, %v3620_v25 }
 0x2b3   : > { %1381 = vmatprep.mubr.f32.mxu0 %v3357_v0  ;;  %1857 = vmatprep.mubr.f32.mxu1 %v3357_v0 }
 0x2b6   : > { %2727 = vmatmul.mubr.msk.f32.gmra.mrb[72].mxu0 %vm426_vm0, %v3646_v38  ;;  %2757 = vmatmul.mubr.msk.f32.gmra.mrb[68].mxu1 %vm426_vm0, %v3624_v30 }
 0x2b7   : > { %1387 = vmatprep.mubr.f32.mxu0 %v3357_v0  ;;  %1863 = vmatprep.mubr.f32.mxu1 %v3357_v0 }
 0x2ba   : > { %2728 = vmatmul.mubr.msk.f32.gmra.mrb[74].mxu0 %vm426_vm0, %v3654_v39  ;;  %2758 = vmatmul.mubr.msk.f32.gmra.mrb[70].mxu1 %vm426_vm0, %v3630_v36  ;;  %v1154_v36 = vld [vmem:[#allocation2 + $0x1f8] sm:$0xff] }
 0x2bb   : > { %1393 = vmatprep.mubr.f32.mxu0 %v3357_v0  ;;  %1869 = vmatprep.mubr.f32.mxu1 %v3357_v0 }
 0x2be   : > { %2729 = vmatmul.mubr.msk.f32.gmra.mrb[76].mxu0 %vm426_vm0, %v3668_v40  ;;  %2759 = vmatmul.mubr.msk.f32.gmra.mrb[72].mxu1 %vm426_vm0, %v3646_v38 }
 0x2bf   : > { %1399 = vmatprep.mubr.f32.mxu0 %v3357_v0  ;;  %1875 = vmatprep.mubr.f32.mxu1 %v3357_v0 }
 0x2c2   : > { %2730 = vmatmul.mubr.msk.f32.gmra.mrb[78].mxu0 %vm426_vm0, %v3676_v41  ;;  %2760 = vmatmul.mubr.msk.f32.gmra.mrb[74].mxu1 %vm426_vm0, %v3654_v39 }
 0x2c3   : > { %1405 = vmatprep.mubr.f32.mxu0 %v3357_v0  ;;  %1881 = vmatprep.mubr.f32.mxu1 %v3357_v0 }
 0x2c6   : > { %2731 = vmatmul.mubr.msk.f32.gmra.mrb[80].mxu0 %vm426_vm0, %v3690_v42  ;;  %2761 = vmatmul.mubr.msk.f32.gmra.mrb[76].mxu1 %vm426_vm0, %v3668_v40  ;;  %v1638_v40 = vld [vmem:[#allocation2 + $0x398] sm:$0xff] }
 0x2c7   : > { %1411 = vmatprep.mubr.f32.mxu0 %v3357_v0  ;;  %1887 = vmatprep.mubr.f32.mxu1 %v3357_v0 }
 0x2ca   : > { %2732 = vmatmul.mubr.msk.f32.gmra.mrb[82].mxu0 %vm426_vm0, %v3698_v43  ;;  %2762 = vmatmul.mubr.msk.f32.gmra.mrb[78].mxu1 %vm426_vm0, %v3676_v41 }
 0x2cb   : > { %1417 = vmatprep.mubr.f32.mxu0 %v3357_v0  ;;  %1893 = vmatprep.mubr.f32.mxu1 %v3357_v0 }
 0x2ce   : > { %2733 = vmatmul.mubr.msk.f32.gmra.mrb[84].mxu0 %vm426_vm0, %v3712_v44  ;;  %2763 = vmatmul.mubr.msk.f32.gmra.mrb[80].mxu1 %vm426_vm0, %v3690_v42 }
 0x2cf   : > { %1423 = vmatprep.mubr.f32.mxu0 %v3357_v0  ;;  %1899 = vmatprep.mubr.f32.mxu1 %v3357_v0 }
 0x2d2   : > { %2734 = vmatmul.mubr.msk.f32.gmra.mrb[86].mxu0 %vm426_vm0, %v3720_v45  ;;  %2764 = vmatmul.mubr.msk.f32.gmra.mrb[82].mxu1 %vm426_vm0, %v3698_v43 }
 0x2d3   : > { %1429 = vmatprep.mubr.f32.mxu0 %v3357_v0  ;;  %1905 = vmatprep.mubr.f32.mxu1 %v3357_v0 }
 0x2d6   : > { %2735 = vmatmul.mubr.msk.f32.gmra.mrb[88].mxu0 %vm426_vm0, %v3732_v47  ;;  %2765 = vmatmul.mubr.msk.f32.gmra.mrb[84].mxu1 %vm426_vm0, %v3712_v44 }
 0x2d7   : > { %1911 = vmatprep.mubr.f32.mxu1 %v3357_v0 }
 0x2da   : > { %2766 = vmatmul.mubr.msk.f32.gmra.mrb[86].mxu1 %vm426_vm0, %v3720_v45 }
 0x2db   : > { %1917 = vmatprep.mubr.f32.mxu1 %v3357_v0 }
 0x2de   : > { %2767 = vmatmul.mubr.msk.f32.gmra.mrb[88].mxu1 %vm426_vm0, %v3732_v47 }
 0x33d   : > { %v1269_v14 = vpop.f32.mrb[34].mxu0 }
 0x33e   : > { %v1271_v15 = vpop.f32.mrb[35].mxu0  ;;  %v2824_v17 = vadd.f32 -103.8827, %v1269_v14 }
 0x33f   : > { %v1437_v16 = vadd.f32 %v1271_v15, %v1148_v13 }
 0x340   : > { %2880 = vst [vmem:[%s3919_s22 + $0x1c0] sm:$0xff] %v2824_v17 }
 0x341   : > { %1493 = vst.msk [vmem:[#allocation2 + $0x1c8] sm:$0xff] %vm248_vm1, %v1437_v16  ;;  %v1275_v19 = vpop.f32.mrb[36].mxu0 }
 0x342   : > { %v1277_v20 = vpop.f32.mrb[37].mxu0  ;;  %v2826_v22 = vadd.f32 -103.8827, %v1275_v19  ;;  %v1162_v19 = vld [vmem:[#allocation2 + $0x238] sm:$0xff] }
 0x343   : > { %v1439_v21 = vadd.f32 %v1277_v20, %v1150_v18  ;;  %v1646_v20 = vld [vmem:[#allocation2 + $0x3d8] sm:$0xff] }
 0x344   : > { %2882 = vst [vmem:[%s3919_s22 + $0x1d0] sm:$0xff] %v2826_v22 }
 0x345   : > { %1495 = vst.msk [vmem:[#allocation2 + $0x1d8] sm:$0xff] %vm248_vm1, %v1439_v21  ;;  %v1281_v0 = vpop.f32.mrb[38].mxu0  ;;  %v1757_v25 = vpop.f32.mrb[34].mxu1 }
 0x346   : > { %v1283_v26 = vpop.f32.mrb[39].mxu0  ;;  %v1759_v30 = vpop.f32.mrb[35].mxu1  ;;  %v2828_v38 = vadd.f32 -103.8827, %v1281_v0  ;;  %v2936_v39 = vadd.f32 -91.4953, %v1757_v25 }
 0x347   : > { %v1441_v33 = vadd.f32 %v1283_v26, %v1152_v23  ;;  %v1925_v35 = vadd.f32 %v1759_v30, %v1636_v24 }
 0x348   : > { %v2208_v37 = vld [vmem:[#allocation2 + $0x1c8] sm:$0xff]  ;;  %2884 = vst [vmem:[%s3919_s22 + $0x1e0] sm:$0xff] %v2828_v38  ;;  %2992 = vst [vmem:[%s3919_s22 + $0x380] sm:$0xff] %v2936_v39 }
 0x349   : > { %v2825_v41 = vadd.f32 -103.8827, %v2208_v37  ;;  %1497 = vst.msk [vmem:[#allocation2 + $0x1e8] sm:$0xff] %vm248_vm1, %v1441_v33  ;;  %1981 = vst.msk [vmem:[#allocation2 + $0x388] sm:$0xff] %vm248_vm1, %v1925_v35  ;;  %v1287_v42 = vpop.f32.mrb[40].mxu0  ;;  %v1763_v43 = vpop.f32.mrb[36].mxu1 }
 0x34a   : > { %v1289_v44 = vpop.f32.mrb[41].mxu0  ;;  %v1765_v45 = vpop.f32.mrb[37].mxu1  ;;  %v2830_v52 = vadd.f32 -103.8827, %v1287_v42  ;;  %v2938_v53 = vadd.f32 -91.4953, %v1763_v43 }
 0x34b   : > { %2881 = vst.msk [vmem:[%s3919_s22 + $0x1c8] sm:$0xff] %vm248_vm1, %v2825_v41  ;;  %v1443_v47 = vadd.f32 %v1289_v44, %v1154_v36  ;;  %v1927_v49 = vadd.f32 %v1765_v45, %v1638_v40  ;;  %v1164_v38 = vld [vmem:[#allocation2 + $0x248] sm:$0xff] }
 0x34c   : > { %v2210_v51 = vld [vmem:[#allocation2 + $0x1d8] sm:$0xff]  ;;  %2886 = vst [vmem:[%s3919_s22 + $0x1f0] sm:$0xff] %v2830_v52  ;;  %2994 = vst [vmem:[%s3919_s22 + $0x390] sm:$0xff] %v2938_v53  ;;  %v1648_v39 = vld [vmem:[#allocation2 + $0x3e8] sm:$0xff] }
 0x34d   : > { %v2827_v55 = vadd.f32 -103.8827, %v2210_v51  ;;  %1499 = vst.msk [vmem:[#allocation2 + $0x1f8] sm:$0xff] %vm248_vm1, %v1443_v47  ;;  %1983 = vst.msk [vmem:[#allocation2 + $0x398] sm:$0xff] %vm248_vm1, %v1927_v49  ;;  %v1293_v56 = vpop.f32.mrb[42].mxu0  ;;  %v1769_v57 = vpop.f32.mrb[38].mxu1 }
 0x34e   : > { %v1295_v58 = vpop.f32.mrb[43].mxu0  ;;  %v1771_v59 = vpop.f32.mrb[39].mxu1  ;;  %v2832_v3 = vadd.f32 -103.8827, %v1293_v56  ;;  %v2940_v4 = vadd.f32 -91.4953, %v1769_v57 }
 0x34f   : > { %2883 = vst.msk [vmem:[%s3919_s22 + $0x1d8] sm:$0xff] %vm248_vm1, %v2827_v55  ;;  %v1445_v60 = vadd.f32 %v1295_v58, %v1156_v50  ;;  %v1929_v61 = vadd.f32 %v1771_v59, %v1640_v54  ;;  %v1166_v54 = vld [vmem:[#allocation2 + $0x258] sm:$0xff] }
 0x350   : > { %v2212_v1 = vld [vmem:[#allocation2 + $0x1e8] sm:$0xff]  ;;  %2888 = vst [vmem:[%s3919_s22 + $0x200] sm:$0xff] %v2832_v3  ;;  %2996 = vst [vmem:[%s3919_s22 + $0x3a0] sm:$0xff] %v2940_v4  ;;  %v1650_v55 = vld [vmem:[#allocation2 + $0x3f8] sm:$0xff] }
 0x351   : > { %v2377_v2 = vld [vmem:[#allocation2 + $0x388] sm:$0xff]  ;;  %v2829_v5 = vadd.f32 -103.8827, %v2212_v1  ;;  %1501 = vst.msk [vmem:[#allocation2 + $0x208] sm:$0xff] %vm248_vm1, %v1445_v60  ;;  %1985 = vst.msk [vmem:[#allocation2 + $0x3a8] sm:$0xff] %vm248_vm1, %v1929_v61  ;;  %v1299_v7 = vpop.f32.mrb[44].mxu0 }
 0x352   : > { %v2937_v6 = vadd.f32 -91.4953, %v2377_v2  ;;  %v1775_v8 = vpop.f32.mrb[40].mxu1  ;;  %v1301_v9 = vpop.f32.mrb[45].mxu0  ;;  %v2834_v32 = vadd.f32 -103.8827, %v1299_v7 }
 0x353   : > { %v1777_v10 = vpop.f32.mrb[41].mxu1  ;;  %2885 = vst.msk [vmem:[%s3919_s22 + $0x1e8] sm:$0xff] %vm248_vm1, %v2829_v5  ;;  %v1447_v11 = vadd.f32 %v1301_v9, %v1158_v62  ;;  %v2942_v34 = vadd.f32 -91.4953, %v1775_v8  ;;  %v1168_v5 = vld [vmem:[#allocation2 + $0x268] sm:$0xff] }
 0x354   : > { %2993 = vst.msk [vmem:[%s3919_s22 + $0x388] sm:$0xff] %vm248_vm1, %v2937_v6  ;;  %v1931_v12 = vadd.f32 %v1777_v10, %v1642_v63  ;;  %v2214_v29 = vld [vmem:[#allocation2 + $0x1f8] sm:$0xff]  ;;  %2890 = vst [vmem:[%s3919_s22 + $0x210] sm:$0xff] %v2834_v32  ;;  %v1652_v6 = vld [vmem:[#allocation2 + $0x408] sm:$0xff] }
 0x355   : > { %v2379_v31 = vld [vmem:[#allocation2 + $0x398] sm:$0xff]  ;;  %v2831_v46 = vadd.f32 -103.8827, %v2214_v29  ;;  %1503 = vst.msk [vmem:[#allocation2 + $0x218] sm:$0xff] %vm248_vm1, %v1447_v11  ;;  %v1305_v13 = vpop.f32.mrb[46].mxu0  ;;  %v1781_v14 = vpop.f32.mrb[42].mxu1 }
 0x356   : > { %v2939_v48 = vadd.f32 -91.4953, %v2379_v31  ;;  %1987 = vst.msk [vmem:[#allocation2 + $0x3b8] sm:$0xff] %vm248_vm1, %v1931_v12  ;;  %2998 = vst [vmem:[%s3919_s22 + $0x3b0] sm:$0xff] %v2942_v34  ;;  %v1307_v15 = vpop.f32.mrb[47].mxu0  ;;  %v1783_v16 = vpop.f32.mrb[43].mxu1 }
 0x357   : > { %2887 = vst.msk [vmem:[%s3919_s22 + $0x1f8] sm:$0xff] %vm248_vm1, %v2831_v46  ;;  %v1449_v17 = vadd.f32 %v1307_v15, %v1160_v27  ;;  %v1933_v18 = vadd.f32 %v1783_v16, %v1644_v28  ;;  %v2836_v23 = vadd.f32 -103.8827, %v1305_v13  ;;  %v2944_v24 = vadd.f32 -91.4953, %v1781_v14  ;;  %v1170_v46 = vld [vmem:[#allocation2 + $0x278] sm:$0xff] }
 0x358   : > { %2995 = vst.msk [vmem:[%s3919_s22 + $0x398] sm:$0xff] %vm248_vm1, %v2939_v48  ;;  %v2216_v21 = vld [vmem:[#allocation2 + $0x208] sm:$0xff]  ;;  %v1654_v48 = vld [vmem:[#allocation2 + $0x418] sm:$0xff] }
 0x359   : > { %v2381_v22 = vld [vmem:[#allocation2 + $0x3a8] sm:$0xff]  ;;  %v2833_v0 = vadd.f32 -103.8827, %v2216_v21  ;;  %1505 = vst.msk [vmem:[#allocation2 + $0x228] sm:$0xff] %vm248_vm1, %v1449_v17  ;;  %1989 = vst.msk [vmem:[#allocation2 + $0x3c8] sm:$0xff] %vm248_vm1, %v1933_v18  ;;  %v1311_v26 = vpop.f32.mrb[48].mxu0 }
 0x35a   : > { %v2941_v25 = vadd.f32 -91.4953, %v2381_v22  ;;  %v1787_v30 = vpop.f32.mrb[44].mxu1  ;;  %2892 = vst [vmem:[%s3919_s22 + $0x220] sm:$0xff] %v2836_v23  ;;  %3000 = vst [vmem:[%s3919_s22 + $0x3c0] sm:$0xff] %v2944_v24  ;;  %v1313_v33 = vpop.f32.mrb[49].mxu0 }
 0x35b   : > { %v1789_v35 = vpop.f32.mrb[45].mxu1  ;;  %2889 = vst.msk [vmem:[%s3919_s22 + $0x208] sm:$0xff] %vm248_vm1, %v2833_v0  ;;  %v1451_v36 = vadd.f32 %v1313_v33, %v1162_v19  ;;  %v2838_v42 = vadd.f32 -103.8827, %v1311_v26  ;;  %v1172_v0 = vld [vmem:[#allocation2 + $0x288] sm:$0xff] }
 0x35c   : > { %2997 = vst.msk [vmem:[%s3919_s22 + $0x3a8] sm:$0xff] %vm248_vm1, %v2941_v25  ;;  %v1935_v37 = vadd.f32 %v1789_v35, %v1646_v20  ;;  %v2218_v40 = vld [vmem:[#allocation2 + $0x218] sm:$0xff]  ;;  %v2946_v43 = vadd.f32 -91.4953, %v1787_v30  ;;  %v1656_v25 = vld [vmem:[#allocation2 + $0x428] sm:$0xff] }
 0x35d   : > { %v2383_v41 = vld [vmem:[#allocation2 + $0x3b8] sm:$0xff]  ;;  %v2835_v44 = vadd.f32 -103.8827, %v2218_v40  ;;  %1507 = vst.msk [vmem:[#allocation2 + $0x238] sm:$0xff] %vm248_vm1, %v1451_v36  ;;  %v1317_v47 = vpop.f32.mrb[50].mxu0  ;;  %v1793_v49 = vpop.f32.mrb[46].mxu1 }
 0x35e   : > { %v2943_v45 = vadd.f32 -91.4953, %v2383_v41  ;;  %1991 = vst.msk [vmem:[#allocation2 + $0x3d8] sm:$0xff] %vm248_vm1, %v1935_v37  ;;  %2894 = vst [vmem:[%s3919_s22 + $0x230] sm:$0xff] %v2838_v42  ;;  %v1319_v50 = vpop.f32.mrb[51].mxu0  ;;  %v1795_v51 = vpop.f32.mrb[47].mxu1 }
 0x35f   : > { %3002 = vst [vmem:[%s3919_s22 + $0x3d0] sm:$0xff] %v2946_v43  ;;  %2891 = vst.msk [vmem:[%s3919_s22 + $0x218] sm:$0xff] %vm248_vm1, %v2835_v44  ;;  %v1453_v52 = vadd.f32 %v1319_v50, %v1164_v38  ;;  %v1937_v53 = vadd.f32 %v1795_v51, %v1648_v39  ;;  %v2840_v58 = vadd.f32 -103.8827, %v1317_v47  ;;  %v2948_v59 = vadd.f32 -91.4953, %v1793_v49 }
 0x360   : > { %2999 = vst.msk [vmem:[%s3919_s22 + $0x3b8] sm:$0xff] %vm248_vm1, %v2943_v45  ;;  %v2220_v56 = vld [vmem:[#allocation2 + $0x228] sm:$0xff]  ;;  %v1174_v44 = vld [vmem:[#allocation2 + $0x298] sm:$0xff] }
 0x361   : > { %v2385_v57 = vld [vmem:[#allocation2 + $0x3c8] sm:$0xff]  ;;  %v2837_v60 = vadd.f32 -103.8827, %v2220_v56  ;;  %1509 = vst.msk [vmem:[#allocation2 + $0x248] sm:$0xff] %vm248_vm1, %v1453_v52  ;;  %1993 = vst.msk [vmem:[#allocation2 + $0x3e8] sm:$0xff] %vm248_vm1, %v1937_v53  ;;  %v1323_v62 = vpop.f32.mrb[52].mxu0 }
 0x362   : > { %v2945_v61 = vadd.f32 -91.4953, %v2385_v57  ;;  %v1799_v63 = vpop.f32.mrb[48].mxu1  ;;  %2896 = vst [vmem:[%s3919_s22 + $0x240] sm:$0xff] %v2840_v58  ;;  %3004 = vst [vmem:[%s3919_s22 + $0x3e0] sm:$0xff] %v2948_v59  ;;  %v1325_v1 = vpop.f32.mrb[53].mxu0 }
 0x363   : > { %v1801_v2 = vpop.f32.mrb[49].mxu1  ;;  %2893 = vst.msk [vmem:[%s3919_s22 + $0x228] sm:$0xff] %vm248_vm1, %v2837_v60  ;;  %v1455_v3 = vadd.f32 %v1325_v1, %v1166_v54  ;;  %v2842_v9 = vadd.f32 -103.8827, %v1323_v62  ;;  %v1658_v45 = vld [vmem:[#allocation2 + $0x438] sm:$0xff]  ;;  %v1176_v60 = vld [vmem:[#allocation2 + $0x2a8] sm:$0xff] }
 0x364   : > { %3001 = vst.msk [vmem:[%s3919_s22 + $0x3c8] sm:$0xff] %vm248_vm1, %v2945_v61  ;;  %v1939_v4 = vadd.f32 %v1801_v2, %v1650_v55  ;;  %v2222_v7 = vld [vmem:[#allocation2 + $0x238] sm:$0xff]  ;;  %v2950_v10 = vadd.f32 -91.4953, %v1799_v63  ;;  %v1660_v61 = vld [vmem:[#allocation2 + $0x448] sm:$0xff] }
 0x365   : > { %v2387_v8 = vld [vmem:[#allocation2 + $0x3d8] sm:$0xff]  ;;  %v2839_v11 = vadd.f32 -103.8827, %v2222_v7  ;;  %1511 = vst.msk [vmem:[#allocation2 + $0x258] sm:$0xff] %vm248_vm1, %v1455_v3  ;;  %v1329_v27 = vpop.f32.mrb[54].mxu0  ;;  %v1805_v28 = vpop.f32.mrb[50].mxu1 }
 0x366   : > { %v2947_v12 = vadd.f32 -91.4953, %v2387_v8  ;;  %1995 = vst.msk [vmem:[#allocation2 + $0x3f8] sm:$0xff] %vm248_vm1, %v1939_v4  ;;  %2898 = vst [vmem:[%s3919_s22 + $0x250] sm:$0xff] %v2842_v9  ;;  %v1331_v29 = vpop.f32.mrb[55].mxu0  ;;  %v1807_v31 = vpop.f32.mrb[51].mxu1 }
 0x367   : > { %3006 = vst [vmem:[%s3919_s22 + $0x3f0] sm:$0xff] %v2950_v10  ;;  %2895 = vst.msk [vmem:[%s3919_s22 + $0x238] sm:$0xff] %vm248_vm1, %v2839_v11  ;;  %v1457_v32 = vadd.f32 %v1331_v29, %v1168_v5  ;;  %v1941_v34 = vadd.f32 %v1807_v31, %v1652_v6  ;;  %v2844_v15 = vadd.f32 -103.8827, %v1329_v27  ;;  %v2952_v16 = vadd.f32 -91.4953, %v1805_v28 }
 0x368   : > { %3003 = vst.msk [vmem:[%s3919_s22 + $0x3d8] sm:$0xff] %vm248_vm1, %v2947_v12  ;;  %v2224_v13 = vld [vmem:[#allocation2 + $0x248] sm:$0xff]  ;;  %v1178_v11 = vld [vmem:[#allocation2 + $0x2b8] sm:$0xff] }
 0x369   : > { %v2389_v14 = vld [vmem:[#allocation2 + $0x3e8] sm:$0xff]  ;;  %v2841_v17 = vadd.f32 -103.8827, %v2224_v13  ;;  %1513 = vst.msk [vmem:[#allocation2 + $0x268] sm:$0xff] %vm248_vm1, %v1457_v32  ;;  %1997 = vst.msk [vmem:[#allocation2 + $0x408] sm:$0xff] %vm248_vm1, %v1941_v34  ;;  %v1335_v19 = vpop.f32.mrb[56].mxu0 }
 0x36a   : > { %v2949_v18 = vadd.f32 -91.4953, %v2389_v14  ;;  %v1811_v20 = vpop.f32.mrb[52].mxu1  ;;  %2900 = vst [vmem:[%s3919_s22 + $0x260] sm:$0xff] %v2844_v15  ;;  %3008 = vst [vmem:[%s3919_s22 + $0x400] sm:$0xff] %v2952_v16  ;;  %v1337_v21 = vpop.f32.mrb[57].mxu0 }
 0x36b   : > { %v1813_v22 = vpop.f32.mrb[53].mxu1  ;;  %2897 = vst.msk [vmem:[%s3919_s22 + $0x248] sm:$0xff] %vm248_vm1, %v2841_v17  ;;  %v1459_v23 = vadd.f32 %v1337_v21, %v1170_v46  ;;  %v2846_v33 = vadd.f32 -103.8827, %v1335_v19  ;;  %v1662_v12 = vld [vmem:[#allocation2 + $0x458] sm:$0xff]  ;;  %v1180_v17 = vld [vmem:[#allocation2 + $0x2c8] sm:$0xff] }
 0x36c   : > { %3005 = vst.msk [vmem:[%s3919_s22 + $0x3e8] sm:$0xff] %vm248_vm1, %v2949_v18  ;;  %v1943_v24 = vadd.f32 %v1813_v22, %v1654_v48  ;;  %v2226_v26 = vld [vmem:[#allocation2 + $0x258] sm:$0xff]  ;;  %v2954_v35 = vadd.f32 -91.4953, %v1811_v20  ;;  %v1664_v18 = vld [vmem:[#allocation2 + $0x468] sm:$0xff] }
 0x36d   : > { %v2391_v30 = vld [vmem:[#allocation2 + $0x3f8] sm:$0xff]  ;;  %v2843_v36 = vadd.f32 -103.8827, %v2226_v26  ;;  %1515 = vst.msk [vmem:[#allocation2 + $0x278] sm:$0xff] %vm248_vm1, %v1459_v23  ;;  %v1341_v38 = vpop.f32.mrb[58].mxu0  ;;  %v1817_v39 = vpop.f32.mrb[54].mxu1 }
 0x36e   : > { %v2951_v37 = vadd.f32 -91.4953, %v2391_v30  ;;  %1999 = vst.msk [vmem:[#allocation2 + $0x418] sm:$0xff] %vm248_vm1, %v1943_v24  ;;  %2902 = vst [vmem:[%s3919_s22 + $0x270] sm:$0xff] %v2846_v33  ;;  %v1343_v40 = vpop.f32.mrb[59].mxu0  ;;  %v1819_v41 = vpop.f32.mrb[55].mxu1 }
 0x36f   : > { %3010 = vst [vmem:[%s3919_s22 + $0x410] sm:$0xff] %v2954_v35  ;;  %2899 = vst.msk [vmem:[%s3919_s22 + $0x258] sm:$0xff] %vm248_vm1, %v2843_v36  ;;  %v1461_v42 = vadd.f32 %v1343_v40, %v1172_v0  ;;  %v1945_v43 = vadd.f32 %v1819_v41, %v1656_v25  ;;  %v2848_v50 = vadd.f32 -103.8827, %v1341_v38  ;;  %v2956_v51 = vadd.f32 -91.4953, %v1817_v39 }
 0x370   : > { %3007 = vst.msk [vmem:[%s3919_s22 + $0x3f8] sm:$0xff] %vm248_vm1, %v2951_v37  ;;  %v2228_v47 = vld [vmem:[#allocation2 + $0x268] sm:$0xff]  ;;  %v1182_v36 = vld [vmem:[#allocation2 + $0x2d8] sm:$0xff] }
 0x371   : > { %v2393_v49 = vld [vmem:[#allocation2 + $0x408] sm:$0xff]  ;;  %v2845_v52 = vadd.f32 -103.8827, %v2228_v47  ;;  %1517 = vst.msk [vmem:[#allocation2 + $0x288] sm:$0xff] %vm248_vm1, %v1461_v42  ;;  %2001 = vst.msk [vmem:[#allocation2 + $0x428] sm:$0xff] %vm248_vm1, %v1945_v43  ;;  %v1347_v54 = vpop.f32.mrb[60].mxu0 }
 0x372   : > { %v2953_v53 = vadd.f32 -91.4953, %v2393_v49  ;;  %v1823_v55 = vpop.f32.mrb[56].mxu1  ;;  %2904 = vst [vmem:[%s3919_s22 + $0x280] sm:$0xff] %v2848_v50  ;;  %3012 = vst [vmem:[%s3919_s22 + $0x420] sm:$0xff] %v2956_v51  ;;  %v1349_v56 = vpop.f32.mrb[61].mxu0 }
 0x373   : > { %v1825_v57 = vpop.f32.mrb[57].mxu1  ;;  %2901 = vst.msk [vmem:[%s3919_s22 + $0x268] sm:$0xff] %vm248_vm1, %v2845_v52  ;;  %v1463_v58 = vadd.f32 %v1349_v56, %v1174_v44  ;;  %v2850_v1 = vadd.f32 -103.8827, %v1347_v54  ;;  %v1666_v37 = vld [vmem:[#allocation2 + $0x478] sm:$0xff]  ;;  %v1184_v52 = vld [vmem:[#allocation2 + $0x2e8] sm:$0xff] }
 0x374   : > { %3009 = vst.msk [vmem:[%s3919_s22 + $0x408] sm:$0xff] %vm248_vm1, %v2953_v53  ;;  %v1947_v59 = vadd.f32 %v1825_v57, %v1658_v45  ;;  %v2230_v62 = vld [vmem:[#allocation2 + $0x278] sm:$0xff]  ;;  %v2958_v2 = vadd.f32 -91.4953, %v1823_v55  ;;  %v1668_v53 = vld [vmem:[#allocation2 + $0x488] sm:$0xff] }
 0x375   : > { %v2395_v63 = vld [vmem:[#allocation2 + $0x418] sm:$0xff]  ;;  %v2847_v3 = vadd.f32 -103.8827, %v2230_v62  ;;  %1519 = vst.msk [vmem:[#allocation2 + $0x298] sm:$0xff] %vm248_vm1, %v1463_v58  ;;  %v1353_v5 = vpop.f32.mrb[62].mxu0  ;;  %v1829_v6 = vpop.f32.mrb[58].mxu1 }
 0x376   : > { %v2955_v4 = vadd.f32 -91.4953, %v2395_v63  ;;  %2003 = vst.msk [vmem:[#allocation2 + $0x438] sm:$0xff] %vm248_vm1, %v1947_v59  ;;  %2906 = vst [vmem:[%s3919_s22 + $0x290] sm:$0xff] %v2850_v1  ;;  %v1355_v7 = vpop.f32.mrb[63].mxu0  ;;  %v1831_v8 = vpop.f32.mrb[59].mxu1 }
 0x377   : > { %3014 = vst [vmem:[%s3919_s22 + $0x430] sm:$0xff] %v2958_v2  ;;  %2903 = vst.msk [vmem:[%s3919_s22 + $0x278] sm:$0xff] %vm248_vm1, %v2847_v3  ;;  %v1465_v9 = vadd.f32 %v1355_v7, %v1176_v60  ;;  %v1949_v10 = vadd.f32 %v1831_v8, %v1660_v61  ;;  %v2852_v29 = vadd.f32 -103.8827, %v1353_v5  ;;  %v2960_v31 = vadd.f32 -91.4953, %v1829_v6 }
 0x378   : > { %3011 = vst.msk [vmem:[%s3919_s22 + $0x418] sm:$0xff] %vm248_vm1, %v2955_v4  ;;  %v2232_v27 = vld [vmem:[#allocation2 + $0x288] sm:$0xff]  ;;  %v1186_v3 = vld [vmem:[#allocation2 + $0x2f8] sm:$0xff] }
 0x379   : > { %v2397_v28 = vld [vmem:[#allocation2 + $0x428] sm:$0xff]  ;;  %v2849_v32 = vadd.f32 -103.8827, %v2232_v27  ;;  %1521 = vst.msk [vmem:[#allocation2 + $0x2a8] sm:$0xff] %vm248_vm1, %v1465_v9  ;;  %2005 = vst.msk [vmem:[#allocation2 + $0x448] sm:$0xff] %vm248_vm1, %v1949_v10  ;;  %v1359_v46 = vpop.f32.mrb[64].mxu0 }
 0x37a   : > { %v2957_v34 = vadd.f32 -91.4953, %v2397_v28  ;;  %v1835_v48 = vpop.f32.mrb[60].mxu1  ;;  %2908 = vst [vmem:[%s3919_s22 + $0x2a0] sm:$0xff] %v2852_v29  ;;  %3016 = vst [vmem:[%s3919_s22 + $0x440] sm:$0xff] %v2960_v31  ;;  %v1361_v13 = vpop.f32.mrb[65].mxu0 }
 0x37b   : > { %v1837_v14 = vpop.f32.mrb[61].mxu1  ;;  %2905 = vst.msk [vmem:[%s3919_s22 + $0x288] sm:$0xff] %vm248_vm1, %v2849_v32  ;;  %v1467_v15 = vadd.f32 %v1361_v13, %v1178_v11  ;;  %v2854_v21 = vadd.f32 -103.8827, %v1359_v46  ;;  %v1670_v4 = vld [vmem:[#allocation2 + $0x498] sm:$0xff]  ;;  %v1188_v32 = vld [vmem:[#allocation2 + $0x308] sm:$0xff] }
 0x37c   : > { %3013 = vst.msk [vmem:[%s3919_s22 + $0x428] sm:$0xff] %vm248_vm1, %v2957_v34  ;;  %v1951_v16 = vadd.f32 %v1837_v14, %v1662_v12  ;;  %v2234_v19 = vld [vmem:[#allocation2 + $0x298] sm:$0xff]  ;;  %v2962_v22 = vadd.f32 -91.4953, %v1835_v48  ;;  %v1672_v34 = vld [vmem:[#allocation2 + $0x4a8] sm:$0xff] }
 0x37d   : > { %v2399_v20 = vld [vmem:[#allocation2 + $0x438] sm:$0xff]  ;;  %v2851_v23 = vadd.f32 -103.8827, %v2234_v19  ;;  %1523 = vst.msk [vmem:[#allocation2 + $0x2b8] sm:$0xff] %vm248_vm1, %v1467_v15  ;;  %v1365_v0 = vpop.f32.mrb[66].mxu0  ;;  %v1841_v25 = vpop.f32.mrb[62].mxu1 }
 0x37e   : > { %v2959_v24 = vadd.f32 -91.4953, %v2399_v20  ;;  %2007 = vst.msk [vmem:[#allocation2 + $0x458] sm:$0xff] %vm248_vm1, %v1951_v16  ;;  %2910 = vst [vmem:[%s3919_s22 + $0x2b0] sm:$0xff] %v2854_v21  ;;  %v1367_v26 = vpop.f32.mrb[67].mxu0  ;;  %v1843_v30 = vpop.f32.mrb[63].mxu1 }
 0x37f   : > { %3018 = vst [vmem:[%s3919_s22 + $0x450] sm:$0xff] %v2962_v22  ;;  %2907 = vst.msk [vmem:[%s3919_s22 + $0x298] sm:$0xff] %vm248_vm1, %v2851_v23  ;;  %v1469_v33 = vadd.f32 %v1367_v26, %v1180_v17  ;;  %v1953_v35 = vadd.f32 %v1843_v30, %v1664_v18  ;;  %v2856_v40 = vadd.f32 -103.8827, %v1365_v0  ;;  %v2964_v41 = vadd.f32 -91.4953, %v1841_v25 }
 0x380   : > { %3015 = vst.msk [vmem:[%s3919_s22 + $0x438] sm:$0xff] %vm248_vm1, %v2959_v24  ;;  %v2236_v38 = vld [vmem:[#allocation2 + $0x2a8] sm:$0xff]  ;;  %v1190_v23 = vld [vmem:[#allocation2 + $0x318] sm:$0xff] }
 0x381   : > { %v2401_v39 = vld [vmem:[#allocation2 + $0x448] sm:$0xff]  ;;  %v2853_v42 = vadd.f32 -103.8827, %v2236_v38  ;;  %1525 = vst.msk [vmem:[#allocation2 + $0x2c8] sm:$0xff] %vm248_vm1, %v1469_v33  ;;  %2009 = vst.msk [vmem:[#allocation2 + $0x468] sm:$0xff] %vm248_vm1, %v1953_v35  ;;  %v1371_v44 = vpop.f32.mrb[68].mxu0 }
 0x382   : > { %v2961_v43 = vadd.f32 -91.4953, %v2401_v39  ;;  %v1847_v45 = vpop.f32.mrb[64].mxu1  ;;  %2912 = vst [vmem:[%s3919_s22 + $0x2c0] sm:$0xff] %v2856_v40  ;;  %3020 = vst [vmem:[%s3919_s22 + $0x460] sm:$0xff] %v2964_v41  ;;  %v1373_v47 = vpop.f32.mrb[69].mxu0 }
 0x383   : > { %v1849_v49 = vpop.f32.mrb[65].mxu1  ;;  %2909 = vst.msk [vmem:[%s3919_s22 + $0x2a8] sm:$0xff] %vm248_vm1, %v2853_v42  ;;  %v1471_v50 = vadd.f32 %v1373_v47, %v1182_v36  ;;  %v2858_v56 = vadd.f32 -103.8827, %v1371_v44  ;;  %v1674_v24 = vld [vmem:[#allocation2 + $0x4b8] sm:$0xff]  ;;  %v1192_v42 = vld [vmem:[#allocation2 + $0x328] sm:$0xff] }
 0x384   : > { %3017 = vst.msk [vmem:[%s3919_s22 + $0x448] sm:$0xff] %vm248_vm1, %v2961_v43  ;;  %v1955_v51 = vadd.f32 %v1849_v49, %v1666_v37  ;;  %v2238_v54 = vld [vmem:[#allocation2 + $0x2b8] sm:$0xff]  ;;  %v2966_v57 = vadd.f32 -91.4953, %v1847_v45  ;;  %v1676_v43 = vld [vmem:[#allocation2 + $0x4c8] sm:$0xff] }
 0x385   : > { %v2403_v55 = vld [vmem:[#allocation2 + $0x458] sm:$0xff]  ;;  %v2855_v58 = vadd.f32 -103.8827, %v2238_v54  ;;  %1527 = vst.msk [vmem:[#allocation2 + $0x2d8] sm:$0xff] %vm248_vm1, %v1471_v50  ;;  %v1377_v60 = vpop.f32.mrb[70].mxu0  ;;  %v1853_v61 = vpop.f32.mrb[66].mxu1 }
 0x386   : > { %v2963_v59 = vadd.f32 -91.4953, %v2403_v55  ;;  %2011 = vst.msk [vmem:[#allocation2 + $0x478] sm:$0xff] %vm248_vm1, %v1955_v51  ;;  %2914 = vst [vmem:[%s3919_s22 + $0x2d0] sm:$0xff] %v2858_v56  ;;  %v1379_v62 = vpop.f32.mrb[71].mxu0  ;;  %v1855_v63 = vpop.f32.mrb[67].mxu1 }
 0x387   : > { %3022 = vst [vmem:[%s3919_s22 + $0x470] sm:$0xff] %v2966_v57  ;;  %2911 = vst.msk [vmem:[%s3919_s22 + $0x2b8] sm:$0xff] %vm248_vm1, %v2855_v58  ;;  %v1473_v1 = vadd.f32 %v1379_v62, %v1184_v52  ;;  %v1957_v2 = vadd.f32 %v1855_v63, %v1668_v53  ;;  %v2860_v7 = vadd.f32 -103.8827, %v1377_v60  ;;  %v2968_v8 = vadd.f32 -91.4953, %v1853_v61 }
 0x388   : > { %3019 = vst.msk [vmem:[%s3919_s22 + $0x458] sm:$0xff] %vm248_vm1, %v2963_v59  ;;  %v2240_v5 = vld [vmem:[#allocation2 + $0x2c8] sm:$0xff]  ;;  %v1194_v58 = vld [vmem:[#allocation2 + $0x338] sm:$0xff] }
 0x389   : > { %v2405_v6 = vld [vmem:[#allocation2 + $0x468] sm:$0xff]  ;;  %v2857_v9 = vadd.f32 -103.8827, %v2240_v5  ;;  %1529 = vst.msk [vmem:[#allocation2 + $0x2e8] sm:$0xff] %vm248_vm1, %v1473_v1  ;;  %2013 = vst.msk [vmem:[#allocation2 + $0x488] sm:$0xff] %vm248_vm1, %v1957_v2  ;;  %v1383_v11 = vpop.f32.mrb[72].mxu0 }
 0x38a   : > { %v2965_v10 = vadd.f32 -91.4953, %v2405_v6  ;;  %v1859_v12 = vpop.f32.mrb[68].mxu1  ;;  %2916 = vst [vmem:[%s3919_s22 + $0x2e0] sm:$0xff] %v2860_v7  ;;  %3024 = vst [vmem:[%s3919_s22 + $0x480] sm:$0xff] %v2968_v8  ;;  %v1385_v27 = vpop.f32.mrb[73].mxu0 }
 0x38b   : > { %v1861_v28 = vpop.f32.mrb[69].mxu1  ;;  %2913 = vst.msk [vmem:[%s3919_s22 + $0x2c8] sm:$0xff] %vm248_vm1, %v2857_v9  ;;  %v1475_v29 = vadd.f32 %v1385_v27, %v1186_v3  ;;  %v2862_v13 = vadd.f32 -103.8827, %v1383_v11  ;;  %v1678_v59 = vld [vmem:[#allocation2 + $0x4d8] sm:$0xff]  ;;  %v1196_v9 = vld [vmem:[#allocation2 + $0x348] sm:$0xff] }
 0x38c   : > { %3021 = vst.msk [vmem:[%s3919_s22 + $0x468] sm:$0xff] %vm248_vm1, %v2965_v10  ;;  %v1959_v31 = vadd.f32 %v1861_v28, %v1670_v4  ;;  %v2242_v46 = vld [vmem:[#allocation2 + $0x2d8] sm:$0xff]  ;;  %v2970_v14 = vadd.f32 -91.4953, %v1859_v12  ;;  %v1680_v10 = vld [vmem:[#allocation2 + $0x4e8] sm:$0xff] }
 0x38d   : > { %v2407_v48 = vld [vmem:[#allocation2 + $0x478] sm:$0xff]  ;;  %v2859_v15 = vadd.f32 -103.8827, %v2242_v46  ;;  %1531 = vst.msk [vmem:[#allocation2 + $0x2f8] sm:$0xff] %vm248_vm1, %v1475_v29  ;;  %v1389_v17 = vpop.f32.mrb[74].mxu0  ;;  %v1865_v18 = vpop.f32.mrb[70].mxu1 }
 0x38e   : > { %v2967_v16 = vadd.f32 -91.4953, %v2407_v48  ;;  %2015 = vst.msk [vmem:[#allocation2 + $0x498] sm:$0xff] %vm248_vm1, %v1959_v31  ;;  %2918 = vst [vmem:[%s3919_s22 + $0x2f0] sm:$0xff] %v2862_v13  ;;  %v1391_v19 = vpop.f32.mrb[75].mxu0  ;;  %v1867_v20 = vpop.f32.mrb[71].mxu1 }
 0x38f   : > { %3026 = vst [vmem:[%s3919_s22 + $0x490] sm:$0xff] %v2970_v14  ;;  %2915 = vst.msk [vmem:[%s3919_s22 + $0x2d8] sm:$0xff] %vm248_vm1, %v2859_v15  ;;  %v1477_v21 = vadd.f32 %v1391_v19, %v1188_v32  ;;  %v1961_v22 = vadd.f32 %v1867_v20, %v1672_v34  ;;  %v2864_v26 = vadd.f32 -103.8827, %v1389_v17  ;;  %v2972_v30 = vadd.f32 -91.4953, %v1865_v18 }
 0x390   : > { %3023 = vst.msk [vmem:[%s3919_s22 + $0x478] sm:$0xff] %vm248_vm1, %v2967_v16  ;;  %v2244_v0 = vld [vmem:[#allocation2 + $0x2e8] sm:$0xff]  ;;  %v1198_v15 = vld [vmem:[#allocation2 + $0x358] sm:$0xff] }
 0x391   : > { %v2409_v25 = vld [vmem:[#allocation2 + $0x488] sm:$0xff]  ;;  %v2861_v33 = vadd.f32 -103.8827, %v2244_v0  ;;  %1533 = vst.msk [vmem:[#allocation2 + $0x308] sm:$0xff] %vm248_vm1, %v1477_v21  ;;  %2017 = vst.msk [vmem:[#allocation2 + $0x4a8] sm:$0xff] %vm248_vm1, %v1961_v22  ;;  %v1395_v36 = vpop.f32.mrb[76].mxu0 }
 0x392   : > { %v2969_v35 = vadd.f32 -91.4953, %v2409_v25  ;;  %v1871_v37 = vpop.f32.mrb[72].mxu1  ;;  %2920 = vst [vmem:[%s3919_s22 + $0x300] sm:$0xff] %v2864_v26  ;;  %3028 = vst [vmem:[%s3919_s22 + $0x4a0] sm:$0xff] %v2972_v30  ;;  %v1397_v38 = vpop.f32.mrb[77].mxu0 }
 0x393   : > { %v1873_v39 = vpop.f32.mrb[73].mxu1  ;;  %2917 = vst.msk [vmem:[%s3919_s22 + $0x2e8] sm:$0xff] %vm248_vm1, %v2861_v33  ;;  %v1479_v40 = vadd.f32 %v1397_v38, %v1190_v23  ;;  %v2866_v47 = vadd.f32 -103.8827, %v1395_v36  ;;  %v1682_v16 = vld [vmem:[#allocation2 + $0x4f8] sm:$0xff]  ;;  %v1200_v33 = vld [vmem:[#allocation2 + $0x368] sm:$0xff] }
 0x394   : > { %3025 = vst.msk [vmem:[%s3919_s22 + $0x488] sm:$0xff] %vm248_vm1, %v2969_v35  ;;  %v1963_v41 = vadd.f32 %v1873_v39, %v1674_v24  ;;  %v2246_v44 = vld [vmem:[#allocation2 + $0x2f8] sm:$0xff]  ;;  %v2974_v49 = vadd.f32 -91.4953, %v1871_v37  ;;  %v1684_v35 = vld [vmem:[#allocation2 + $0x508] sm:$0xff] }
 0x395   : > { %v2411_v45 = vld [vmem:[#allocation2 + $0x498] sm:$0xff]  ;;  %v2863_v50 = vadd.f32 -103.8827, %v2246_v44  ;;  %1535 = vst.msk [vmem:[#allocation2 + $0x318] sm:$0xff] %vm248_vm1, %v1479_v40  ;;  %v1401_v52 = vpop.f32.mrb[78].mxu0  ;;  %v1877_v53 = vpop.f32.mrb[74].mxu1 }
 0x396   : > { %v2971_v51 = vadd.f32 -91.4953, %v2411_v45  ;;  %2019 = vst.msk [vmem:[#allocation2 + $0x4b8] sm:$0xff] %vm248_vm1, %v1963_v41  ;;  %2922 = vst [vmem:[%s3919_s22 + $0x310] sm:$0xff] %v2866_v47  ;;  %v1403_v54 = vpop.f32.mrb[79].mxu0  ;;  %v1879_v55 = vpop.f32.mrb[75].mxu1 }
 0x397   : > { %3030 = vst [vmem:[%s3919_s22 + $0x4b0] sm:$0xff] %v2974_v49  ;;  %2919 = vst.msk [vmem:[%s3919_s22 + $0x2f8] sm:$0xff] %vm248_vm1, %v2863_v50  ;;  %v1481_v56 = vadd.f32 %v1403_v54, %v1192_v42  ;;  %v1965_v57 = vadd.f32 %v1879_v55, %v1676_v43  ;;  %v2868_v62 = vadd.f32 -103.8827, %v1401_v52  ;;  %v2976_v63 = vadd.f32 -91.4953, %v1877_v53 }
 0x398   : > { %3027 = vst.msk [vmem:[%s3919_s22 + $0x498] sm:$0xff] %vm248_vm1, %v2971_v51  ;;  %v2248_v60 = vld [vmem:[#allocation2 + $0x308] sm:$0xff]  ;;  %v1202_v50 = vld [vmem:[#allocation2 + $0x378] sm:$0xff] }
 0x399   : > { %v2413_v61 = vld [vmem:[#allocation2 + $0x4a8] sm:$0xff]  ;;  %v2865_v1 = vadd.f32 -103.8827, %v2248_v60  ;;  %1537 = vst.msk [vmem:[#allocation2 + $0x328] sm:$0xff] %vm248_vm1, %v1481_v56  ;;  %2021 = vst.msk [vmem:[#allocation2 + $0x4c8] sm:$0xff] %vm248_vm1, %v1965_v57  ;;  %v1407_v3 = vpop.f32.mrb[80].mxu0 }
 0x39a   : > { %v2973_v2 = vadd.f32 -91.4953, %v2413_v61  ;;  %v1883_v4 = vpop.f32.mrb[76].mxu1  ;;  %2924 = vst [vmem:[%s3919_s22 + $0x320] sm:$0xff] %v2868_v62  ;;  %3032 = vst [vmem:[%s3919_s22 + $0x4c0] sm:$0xff] %v2976_v63  ;;  %v1409_v5 = vpop.f32.mrb[81].mxu0 }
 0x39b   : > { %v1885_v6 = vpop.f32.mrb[77].mxu1  ;;  %2921 = vst.msk [vmem:[%s3919_s22 + $0x308] sm:$0xff] %vm248_vm1, %v2865_v1  ;;  %v1483_v7 = vadd.f32 %v1409_v5, %v1194_v58  ;;  %v2870_v27 = vadd.f32 -103.8827, %v1407_v3  ;;  %v1686_v51 = vld [vmem:[#allocation2 + $0x518] sm:$0xff]  ;;  %v1688_v1 = vld [vmem:[#allocation2 + $0x528] sm:$0xff] }
 0x39c   : > { %3029 = vst.msk [vmem:[%s3919_s22 + $0x4a8] sm:$0xff] %vm248_vm1, %v2973_v2  ;;  %v1967_v8 = vadd.f32 %v1885_v6, %v1678_v59  ;;  %v2250_v11 = vld [vmem:[#allocation2 + $0x318] sm:$0xff]  ;;  %v2978_v28 = vadd.f32 -91.4953, %v1883_v4 }
 0x39d   : > { %v2415_v12 = vld [vmem:[#allocation2 + $0x4b8] sm:$0xff]  ;;  %v2867_v29 = vadd.f32 -103.8827, %v2250_v11  ;;  %1539 = vst.msk [vmem:[#allocation2 + $0x338] sm:$0xff] %vm248_vm1, %v1483_v7  ;;  %v1413_v32 = vpop.f32.mrb[82].mxu0  ;;  %v1889_v34 = vpop.f32.mrb[78].mxu1 }
 0x39e   : > { %v2975_v31 = vadd.f32 -91.4953, %v2415_v12  ;;  %2023 = vst.msk [vmem:[#allocation2 + $0x4d8] sm:$0xff] %vm248_vm1, %v1967_v8  ;;  %2926 = vst [vmem:[%s3919_s22 + $0x330] sm:$0xff] %v2870_v27  ;;  %v1415_v46 = vpop.f32.mrb[83].mxu0  ;;  %v1891_v48 = vpop.f32.mrb[79].mxu1 }
 0x39f   : > { %3034 = vst [vmem:[%s3919_s22 + $0x4d0] sm:$0xff] %v2978_v28  ;;  %2923 = vst.msk [vmem:[%s3919_s22 + $0x318] sm:$0xff] %vm248_vm1, %v2867_v29  ;;  %v1485_v13 = vadd.f32 %v1415_v46, %v1196_v9  ;;  %v1969_v14 = vadd.f32 %v1891_v48, %v1680_v10  ;;  %v2872_v19 = vadd.f32 -103.8827, %v1413_v32  ;;  %v2980_v20 = vadd.f32 -91.4953, %v1889_v34 }
 0x3a0   : > { %3031 = vst.msk [vmem:[%s3919_s22 + $0x4b8] sm:$0xff] %vm248_vm1, %v2975_v31  ;;  %v2252_v17 = vld [vmem:[#allocation2 + $0x328] sm:$0xff]  ;;  %v1690_v28 = vld [vmem:[#allocation2 + $0x538] sm:$0xff] }
 0x3a1   : > { %v2417_v18 = vld [vmem:[#allocation2 + $0x4c8] sm:$0xff]  ;;  %v2869_v21 = vadd.f32 -103.8827, %v2252_v17  ;;  %1541 = vst.msk [vmem:[#allocation2 + $0x348] sm:$0xff] %vm248_vm1, %v1485_v13  ;;  %2025 = vst.msk [vmem:[#allocation2 + $0x4e8] sm:$0xff] %vm248_vm1, %v1969_v14  ;;  %v1419_v23 = vpop.f32.mrb[84].mxu0 }
 0x3a2   : > { %v2977_v22 = vadd.f32 -91.4953, %v2417_v18  ;;  %v1895_v24 = vpop.f32.mrb[80].mxu1  ;;  %2928 = vst [vmem:[%s3919_s22 + $0x340] sm:$0xff] %v2872_v19  ;;  %3036 = vst [vmem:[%s3919_s22 + $0x4e0] sm:$0xff] %v2980_v20  ;;  %v1421_v0 = vpop.f32.mrb[85].mxu0 }
 0x3a3   : > { %v1897_v25 = vpop.f32.mrb[81].mxu1  ;;  %2925 = vst.msk [vmem:[%s3919_s22 + $0x328] sm:$0xff] %vm248_vm1, %v2869_v21  ;;  %v1487_v26 = vadd.f32 %v1421_v0, %v1198_v15  ;;  %v2874_v38 = vadd.f32 -103.8827, %v1419_v23 }
 0x3a4   : > { %3033 = vst.msk [vmem:[%s3919_s22 + $0x4c8] sm:$0xff] %vm248_vm1, %v2977_v22  ;;  %v1971_v30 = vadd.f32 %v1897_v25, %v1682_v16  ;;  %v2254_v36 = vld [vmem:[#allocation2 + $0x338] sm:$0xff]  ;;  %v2982_v39 = vadd.f32 -91.4953, %v1895_v24 }
 0x3a5   : > { %v2419_v37 = vld [vmem:[#allocation2 + $0x4d8] sm:$0xff]  ;;  %v2871_v40 = vadd.f32 -103.8827, %v2254_v36  ;;  %1543 = vst.msk [vmem:[#allocation2 + $0x358] sm:$0xff] %vm248_vm1, %v1487_v26  ;;  %v1425_v42 = vpop.f32.mrb[86].mxu0  ;;  %v1901_v43 = vpop.f32.mrb[82].mxu1 }
 0x3a6   : > { %v2979_v41 = vadd.f32 -91.4953, %v2419_v37  ;;  %2027 = vst.msk [vmem:[#allocation2 + $0x4f8] sm:$0xff] %vm248_vm1, %v1971_v30  ;;  %2930 = vst [vmem:[%s3919_s22 + $0x350] sm:$0xff] %v2874_v38  ;;  %v1427_v44 = vpop.f32.mrb[87].mxu0  ;;  %v1903_v45 = vpop.f32.mrb[83].mxu1 }
 0x3a7   : > { %3038 = vst [vmem:[%s3919_s22 + $0x4f0] sm:$0xff] %v2982_v39  ;;  %2927 = vst.msk [vmem:[%s3919_s22 + $0x338] sm:$0xff] %vm248_vm1, %v2871_v40  ;;  %v1489_v47 = vadd.f32 %v1427_v44, %v1200_v33  ;;  %v1973_v49 = vadd.f32 %v1903_v45, %v1684_v35  ;;  %v2876_v54 = vadd.f32 -103.8827, %v1425_v42  ;;  %v2984_v55 = vadd.f32 -91.4953, %v1901_v43 }
 0x3a8   : > { %3035 = vst.msk [vmem:[%s3919_s22 + $0x4d8] sm:$0xff] %vm248_vm1, %v2979_v41  ;;  %v2256_v52 = vld [vmem:[#allocation2 + $0x348] sm:$0xff] }
 0x3a9   : > { %v2421_v53 = vld [vmem:[#allocation2 + $0x4e8] sm:$0xff]  ;;  %v2873_v56 = vadd.f32 -103.8827, %v2256_v52  ;;  %1545 = vst.msk [vmem:[#allocation2 + $0x368] sm:$0xff] %vm248_vm1, %v1489_v47  ;;  %2029 = vst.msk [vmem:[#allocation2 + $0x508] sm:$0xff] %vm248_vm1, %v1973_v49  ;;  %v1431_v58 = vpop.f32.mrb[88].mxu0 }
 0x3aa   : > { %v2981_v57 = vadd.f32 -91.4953, %v2421_v53  ;;  %v1907_v59 = vpop.f32.mrb[84].mxu1  ;;  %2932 = vst [vmem:[%s3919_s22 + $0x360] sm:$0xff] %v2876_v54  ;;  %3040 = vst [vmem:[%s3919_s22 + $0x500] sm:$0xff] %v2984_v55  ;;  %v1433_v60 = vpop.f32.mrb[89].mxu0 }
 0x3ab   : > { %v1909_v61 = vpop.f32.mrb[85].mxu1  ;;  %2929 = vst.msk [vmem:[%s3919_s22 + $0x348] sm:$0xff] %vm248_vm1, %v2873_v56  ;;  %v1491_v62 = vadd.f32 %v1433_v60, %v1202_v50  ;;  %v2878_v4 = vadd.f32 -103.8827, %v1431_v58 }
 0x3ac   : > { %3037 = vst.msk [vmem:[%s3919_s22 + $0x4e8] sm:$0xff] %vm248_vm1, %v2981_v57  ;;  %v1975_v63 = vadd.f32 %v1909_v61, %v1686_v51  ;;  %v2258_v2 = vld [vmem:[#allocation2 + $0x358] sm:$0xff]  ;;  %v2986_v5 = vadd.f32 -91.4953, %v1907_v59 }
 0x3ad   : > { %v2423_v3 = vld [vmem:[#allocation2 + $0x4f8] sm:$0xff]  ;;  %v2875_v6 = vadd.f32 -103.8827, %v2258_v2  ;;  %1547 = vst.msk [vmem:[#allocation2 + $0x378] sm:$0xff] %vm248_vm1, %v1491_v62  ;;  %v1913_v8 = vpop.f32.mrb[86].mxu1  ;;  %2934 = vst [vmem:[%s3919_s22 + $0x370] sm:$0xff] %v2878_v4 }
 0x3ae   : > { %v2983_v7 = vadd.f32 -91.4953, %v2423_v3  ;;  %2031 = vst.msk [vmem:[#allocation2 + $0x518] sm:$0xff] %vm248_vm1, %v1975_v63  ;;  %3042 = vst [vmem:[%s3919_s22 + $0x510] sm:$0xff] %v2986_v5  ;;  %v1915_v9 = vpop.f32.mrb[87].mxu1 }
 0x3af   : > { %2931 = vst.msk [vmem:[%s3919_s22 + $0x358] sm:$0xff] %vm248_vm1, %v2875_v6  ;;  %v1977_v10 = vadd.f32 %v1915_v9, %v1688_v1  ;;  %v2988_v27 = vadd.f32 -91.4953, %v1913_v8 }
 0x3b0   : > { %3039 = vst.msk [vmem:[%s3919_s22 + $0x4f8] sm:$0xff] %vm248_vm1, %v2983_v7  ;;  %v2260_v11 = vld [vmem:[#allocation2 + $0x368] sm:$0xff] }
 0x3b1   : > { %v2425_v12 = vld [vmem:[#allocation2 + $0x508] sm:$0xff]  ;;  %v2877_v29 = vadd.f32 -103.8827, %v2260_v11  ;;  %2033 = vst.msk [vmem:[#allocation2 + $0x528] sm:$0xff] %vm248_vm1, %v1977_v10  ;;  %v1919_v32 = vpop.f32.mrb[88].mxu1  ;;  %3044 = vst [vmem:[%s3919_s22 + $0x520] sm:$0xff] %v2988_v27 }
 0x3b2   : > { %v2985_v31 = vadd.f32 -91.4953, %v2425_v12  ;;  %v1921_v34 = vpop.f32.mrb[89].mxu1  ;;  %v2990_v14 = vadd.f32 -91.4953, %v1919_v32 }
 0x3b3   : > { %2933 = vst.msk [vmem:[%s3919_s22 + $0x368] sm:$0xff] %vm248_vm1, %v2877_v29  ;;  %v1979_v46 = vadd.f32 %v1921_v34, %v1690_v28 }
 0x3b4   : > { %3041 = vst.msk [vmem:[%s3919_s22 + $0x508] sm:$0xff] %vm248_vm1, %v2985_v31  ;;  %v2262_v48 = vld [vmem:[#allocation2 + $0x378] sm:$0xff]  ;;  %3046 = vst [vmem:[%s3919_s22 + $0x530] sm:$0xff] %v2990_v14 }
 0x3b5   : > { %v2427_v13 = vld [vmem:[#allocation2 + $0x518] sm:$0xff]  ;;  %v2879_v15 = vadd.f32 -103.8827, %v2262_v48  ;;  %2035 = vst.msk [vmem:[#allocation2 + $0x538] sm:$0xff] %vm248_vm1, %v1979_v46 }
 0x3b6   : > { %v2987_v16 = vadd.f32 -91.4953, %v2427_v13 }
 0x3b7   : > { %2935 = vst.msk [vmem:[%s3919_s22 + $0x378] sm:$0xff] %vm248_vm1, %v2879_v15 }
 0x3b8   : > { %3043 = vst.msk [vmem:[%s3919_s22 + $0x518] sm:$0xff] %vm248_vm1, %v2987_v16  ;;  %v2429_v17 = vld [vmem:[#allocation2 + $0x528] sm:$0xff] }
 0x3b9   : > { %v2989_v18 = vadd.f32 -91.4953, %v2429_v17 }
 0x3bb   : > { %3045 = vst.msk [vmem:[%s3919_s22 + $0x528] sm:$0xff] %vm248_vm1, %v2989_v18 }
 0x3bc   : > { %v2431_v19 = vld [vmem:[#allocation2 + $0x538] sm:$0xff] }
 0x3bd   : > { %v2991_v20 = vadd.f32 -91.4953, %v2431_v19 }
 0x3bf   : > { %3047 = vst.msk [vmem:[%s3919_s22 + $0x538] sm:$0xff] %vm248_vm1, %v2991_v20 }
 0x3c0   : > { %3271 = shalt.err (!%p3268_p1)
}
 0x3c1   : > { %s3272_s8 = scalar_lea.hbm %s4424_s20, 21504  ;;  %s3276_s26 = scalar_lea.hbm %s4480_s3, 43008 }
 0x3c2   : > { %p3273_p6 = scmp.ne.s32.totalorder %s4424_s20, %s3272_s8  ;;  %p3277_p11 = scmp.lt.u32.totalorder %s4424_s20, %s4480_s3 }
 0x3c3   : > { %p3278_p3 = scmp.lt.u32.totalorder %s3276_s26, %s3272_s8  ;;  %p3280_p4 = scmp.lt.u32.totalorder %s3272_s8, %s4424_s20 }
 0x3c4   : > { %p3274_p9 = pnand %p3273_p6, %p4496_p7 }
 0x3c5   : > { %p3279_p12 = por %p3278_p3, %p3277_p11 }
 0x3c6   : > { %p3275_p13 = pneg %p3274_p9 }
 0x3c7   : > { %p3281_p10 = por %p3280_p4, %p3279_p12 }
 0x3c9   : > { %p3282_p2 = pnand %p3281_p10, %p3275_p13 }
 0x3cb   : > { %3285 = shalt.err (!%p3282_p2)
}
 0x3cc   : > { %s3359_s22 = smov 256   ;;  %s3360_s9 = smov 16  }
 0x3cd   : > { %3092 = dma.vmem_to_hbm [thread:$0]  (%p4496_p7), %s4426_s28, 21504, %s4424_s20, %s2546_s7, %s3359_s22, %s3359_s22, %s3360_s9  }
 0x3ce PF: > { %s2574_s10 = sand.u32 1, %s3328_s12   ;;  %p4497_p8 = scmp.ne.s32.totalorder %s4487_s24, 0 }
 0x3cf   : > { %p4498_p0 = scmp.ge.s32.totalorder %s3348_s17, 2  ;;  %s2575_s11 = scalar_lea.sflag [#allocation5], %s2574_s10 }
 0x3d1   : > { %p3106_p5 = pnand %p4498_p0, %p4497_p8 }
 0x3d3   : > { %3323 = dma.done.wait (!%p3106_p5), %s2575_s11, 21504  }
 0x3d4   : > { %3325 = vsyncadd (!%p3106_p5), %s2575_s11, 4294945792  ;;  %s18_s17 = sadd.s32 1, %s3348_s17   ;;  %s4499_s12 = smov %s3332_s13 }
 0x3d5   : > { %p15_p1 = scmp.ge.s32.totalorder %s18_s17, 4   ;;  %s4500_s13 = smov %s3336_s14 }
 0x3d6   : > { %s4501_s14 = smov %s3535_s27  ;;  %s4502_s15 = smov %s3344_s16 }
 0x3d7   : > { %s4503_s16 = smov %s4505_s6  ;;  %17 = sbr.rel (!%p15_p1) target bundleno = 6 (0x6), region = 99 }
 0x3de   :  { %2580 = vsyncpa [#allocation4], 1 }
 0x3df   :  { %2582 = vsyncpa [#allocation4 + $0x1], 1 }
 0x3e0   :  { %2583 = vsyncpa [#allocation7], 1 }
 0x3e1   :  { %2584 = vsyncpa [#allocation5], 1 }
 0x3e2   :  { %2586 = vsyncpa [#allocation5 + $0x1], 1 }

</bundles_post_ra>
